<compile_context>
chip_gen: v6e
topology: v6e:2x2x1
jax: 0.10.0
libtpu: 0.0.40
codegen_flags: <defaults>
</compile_context>

<pallas_src>
import math

import jax
import jax.numpy as jnp
from jax import lax
from jax.experimental import pallas as pl
from jax.experimental.pallas import tpu as pltpu  # noqa: F401  (TPU backend)


# ----------------------------------------------------------------------------
# Deterministic parameter construction (mirrors the PyTorch __init__ shapes)
# ----------------------------------------------------------------------------
def fractal_transform(dim: int) -> jnp.ndarray:
    """Same deterministic init as FractalNeuralOperator._initialize_fractal_transform."""
    d = min(dim, 64)
    x = jnp.linspace(-0.5, 0.5, d)
    X, Y = jnp.meshgrid(x, x, indexing="ij")
    R = jnp.sqrt(X ** 2 + Y ** 2)
    Theta = jnp.arctan2(Y, X)
    return (jnp.sin(R * 2.0 * jnp.pi) * jnp.cos(Theta * 3.0)).astype(jnp.float32)


def init_params(key, dim: int, num_layers: int):
    """Build all weights for FractalTransformer(dim, num_heads, num_layers)."""
    # Guard: the fractal transform is capped at 64x64, so x @ transform requires dim <= 64.
    assert dim <= 64, "fractal transform capped at 64; dim > 64 would shape-error"

    emb = fractal_transform(dim)                                   # embed.transform
    # q_op / k_op / v_op all get the SAME deterministic transform -> one matrix per layer.
    wt = jnp.stack([fractal_transform(dim)] * num_layers)          # (NL, D, D)

    bound = 1.0 / math.sqrt(dim)                                   # nn.Linear default init
    ks = jax.random.split(key, 2 * num_layers)
    wo_list, bo_list = [], []
    for l in range(num_layers):
        w = jax.random.uniform(ks[2 * l], (dim, dim), jnp.float32, -bound, bound)
        b = jax.random.uniform(ks[2 * l + 1], (dim,), jnp.float32, -bound, bound)
        wo_list.append(w.T)                                        # pre-transpose: x @ W^T
        bo_list.append(b.reshape(1, dim))
    wo = jnp.stack(wo_list)                                        # (NL, D, D)
    bo = jnp.stack(bo_list)                                        # (NL, 1, D)

    gamma = jnp.ones((1, dim), jnp.float32)                        # LayerNorm weight
    beta = jnp.zeros((1, dim), jnp.float32)                        # LayerNorm bias
    return emb, wt, wo, bo, gamma, beta


# ----------------------------------------------------------------------------
# Pallas kernel: full forward in one invocation (no grid).
# ----------------------------------------------------------------------------
def _make_kernel(batch: int, seq: int, dim: int, num_heads: int, num_layers: int):
    dh = dim // num_heads
    scale = 1.0 / math.sqrt(dh)

    def kernel(x_ref, emb_ref, wt_ref, wo_ref, bo_ref, g_ref, b_ref, o_ref):
        bl = batch * seq
        # Fold (B, L, D) -> (B*L, D): cheap major-dim collapse; bigger MXU M for
        # every projection and a single pass over both batch elements.
        x = x_ref[...].reshape(bl, dim)

        # embed: x @ transform
        x = jnp.dot(x, emb_ref[...], preferred_element_type=jnp.float32)

        for l in range(num_layers):
            # Single Q/K/V projection per layer (q == k == v by construction).
            xt = jnp.dot(x, wt_ref[l], preferred_element_type=jnp.float32)  # (BL, D)
            xt3 = xt.reshape(batch, seq, dim)                               # (B, L, D)
            # Fold the 1/sqrt(dh) scale into Q once (cheaper than scaling every
            # (L, L) score matrix).
            q3 = xt3 * scale

            head_outs = []
            for h in range(num_heads):
                qh = q3[:, :, h * dh:(h + 1) * dh]                          # (B, L, Dh) scaled
                kh = xt3[:, :, h * dh:(h + 1) * dh]                         # (B, L, Dh)
                # scores = q @ k^T, batched over B (single-batch-dim dot_general).
                s = jnp.einsum("bqd,bkd->bqk", qh, kh,
                               preferred_element_type=jnp.float32)          # (B, L, L)
                s = s - jnp.max(s, axis=-1, keepdims=True)
                p = jnp.exp(s)
                # Normalize with the EUP approximate reciprocal (co-issues with MXU/VPU).
                p = p * pl.reciprocal(jnp.sum(p, axis=-1, keepdims=True), approx=True)
                head_outs.append(jnp.einsum("bqk,bkd->bqd", p, kh,
                                            preferred_element_type=jnp.float32))
            attn = jnp.concatenate(head_outs, axis=-1).reshape(bl, dim)     # (BL, D)

            # out_proj (Linear): attn @ W^T + b  (W pre-transposed host-side)
            x = jnp.dot(attn, wo_ref[l],
                        preferred_element_type=jnp.float32) + bo_ref[l]

        # final LayerNorm (eps=1e-5, biased variance, elementwise affine)
        mean = jnp.mean(x, axis=-1, keepdims=True)
        var = jnp.mean((x - mean) ** 2, axis=-1, keepdims=True)
        y = (x - mean) * lax.rsqrt(var + 1e-5) * g_ref[...] + b_ref[...]

        o_ref[...] = y.reshape(batch, seq, dim).astype(o_ref.dtype)

    return kernel


def fractal_transformer_forward(x, params, *, num_heads: int, num_layers: int):
    emb, wt, wo, bo, gamma, beta = params
    B, L, D = x.shape
    kernel = _make_kernel(B, L, D, num_heads, num_layers)

    # No grid: every operand is a full-array VMEM block, single kernel invocation.
    return pl.pallas_call(
        kernel,
        out_shape=jax.ShapeDtypeStruct((B, L, D), x.dtype),
    )(x, emb, wt, wo, bo, gamma, beta)


# ----------------------------------------------------------------------------
# Pure-JAX reference (mirrors the PyTorch forward exactly) for validation
# ----------------------------------------------------------------------------
def reference_forward(x, params, *, num_heads: int, num_layers: int):
    emb, wt, wo, bo, gamma, beta = params
    B, L, D = x.shape
    dh = D // num_heads
    x = x @ emb
    for l in range(num_layers):
        qkv = x @ wt[l]                      # q == k == v at init (same fractal transform)
        q = qkv.reshape(B, L, num_heads, dh).transpose(0, 2, 1, 3)
        s = jnp.einsum("bhqd,bhkd->bhqk", q, q) / math.sqrt(dh)
        p = jax.nn.softmax(s, axis=-1)
        o = jnp.einsum("bhqk,bhkd->bhqd", p, q).transpose(0, 2, 1, 3).reshape(B, L, D)
        x = o @ wo[l] + bo[l]
    mean = jnp.mean(x, axis=-1, keepdims=True)
    var = jnp.mean((x - mean) ** 2, axis=-1, keepdims=True)
    return (x - mean) / jnp.sqrt(var + 1e-5) * gamma + beta


if __name__ == "__main__":
    # Small config consistent with the module: dim=32, heads=4, layers=2.
    B, L, D = 2, 8, 32
    NUM_HEADS, NUM_LAYERS = 4, 2

    key = jax.random.PRNGKey(0)
    k_x, k_p = jax.random.split(key)
    x = jax.random.normal(k_x, (B, L, D), jnp.float32)
    params = init_params(k_p, D, NUM_LAYERS)

    out = fractal_transformer_forward(x, params, num_heads=NUM_HEADS,
                                      num_layers=NUM_LAYERS)
    out = jax.block_until_ready(out)

    ref = reference_forward(x, params, num_heads=NUM_HEADS, num_layers=NUM_LAYERS)
    assert out.shape == (B, L, D)
    # Tolerance slightly loosened because the in-kernel softmax uses the EUP
    # approximate reciprocal; outputs are O(1) post-LayerNorm so 1e-2 is still tight.
    assert jnp.allclose(out, ref, atol=1e-2, rtol=1e-2), "mismatch vs JAX reference"

    print("KERNEL_OK")
</pallas_src>

<mosaic_0001>
module attributes {stable_mosaic.version = 11 : i64} {
  func.func @kernel(%arg0: memref<2x8x32xf32, #tpu.memory_space<vmem>>, %arg1: memref<32x32xf32, #tpu.memory_space<vmem>>, %arg2: memref<2x32x32xf32, #tpu.memory_space<vmem>>, %arg3: memref<2x32x32xf32, #tpu.memory_space<vmem>>, %arg4: memref<2x1x32xf32, #tpu.memory_space<vmem>>, %arg5: memref<1x32xf32, #tpu.memory_space<vmem>>, %arg6: memref<1x32xf32, #tpu.memory_space<vmem>>, %arg7: memref<2x8x32xf32, #tpu.memory_space<vmem>>) attributes {dimension_semantics = [], scalar_prefetch = 0 : i64, scratch_operands = 0 : i64, tpu.core_type = #tpu.core_type<tc>} {
    %c0 = arith.constant 0 : index
    %c0_0 = arith.constant 0 : index
    %c0_1 = arith.constant 0 : index
    %0 = vector.load %arg0[%c0, %c0_0, %c0_1] : memref<2x8x32xf32, #tpu.memory_space<vmem>>, vector<2x8x32xf32>
    %1 = vector.shape_cast %0 : vector<2x8x32xf32> to vector<16x32xf32>
    %c0_2 = arith.constant 0 : index
    %c0_3 = arith.constant 0 : index
    %2 = vector.load %arg1[%c0_2, %c0_3] : memref<32x32xf32, #tpu.memory_space<vmem>>, vector<32x32xf32>
    %cst = arith.constant dense<0.000000e+00> : vector<16x32xf32>
    %3 = tpu.matmul %1, %2, %cst {dimension_numbers = #tpu.dot_dimension_numbers<[1], [0], [0], [1], [0, 0, 1, 1], [], []>} : vector<16x32xf32>, vector<32x32xf32>, vector<16x32xf32> -> vector<16x32xf32>
    %c0_4 = arith.constant 0 : index
    %c0_5 = arith.constant 0 : index
    %c0_6 = arith.constant 0 : index
    %4 = vector.load %arg2[%c0_4, %c0_5, %c0_6] : memref<2x32x32xf32, #tpu.memory_space<vmem>>, vector<1x32x32xf32>
    %5 = vector.shape_cast %4 : vector<1x32x32xf32> to vector<32x32xf32>
    %cst_7 = arith.constant dense<0.000000e+00> : vector<16x32xf32>
    %6 = tpu.matmul %3, %5, %cst_7 {dimension_numbers = #tpu.dot_dimension_numbers<[1], [0], [0], [1], [0, 0, 1, 1], [], []>} : vector<16x32xf32>, vector<32x32xf32>, vector<16x32xf32> -> vector<16x32xf32>
    %7 = vector.shape_cast %6 : vector<16x32xf32> to vector<2x8x32xf32>
    %cst_8 = arith.constant 0.353553385 : f32
    %8 = vector.broadcast %cst_8 : f32 to vector<2x8x32xf32>
    %9 = arith.mulf %7, %8 : vector<2x8x32xf32>
    %10 = vector.extract_strided_slice %9 {offsets = [0, 0, 0], sizes = [2, 8, 8], strides = [1, 1, 1]} : vector<2x8x32xf32> to vector<2x8x8xf32>
    %11 = vector.extract_strided_slice %7 {offsets = [0, 0, 0], sizes = [2, 8, 8], strides = [1, 1, 1]} : vector<2x8x32xf32> to vector<2x8x8xf32>
    "tpu.trace_start"() <{level = 10 : i32, message = "bqd,bkd->bqk"}> : () -> ()
    %cst_9 = arith.constant dense<0.000000e+00> : vector<2x8x8xf32>
    %12 = tpu.matmul %10, %11, %cst_9 {dimension_numbers = #tpu.dot_dimension_numbers<[2], [2], [1], [1], [0, 0, 0, 1, 1, 1], [0], [0]>} : vector<2x8x8xf32>, vector<2x8x8xf32>, vector<2x8x8xf32> -> vector<2x8x8xf32>
    "tpu.trace_stop"() : () -> ()
    %cst_10 = arith.constant dense<0xFF800000> : vector<2x8xf32>
    %13 = vector.multi_reduction <maximumf>, %12, %cst_10 [2] : vector<2x8x8xf32> to vector<2x8xf32>
    %14 = vector.shape_cast %13 : vector<2x8xf32> to vector<2x8x1xf32>
    %15 = vector.broadcast %14 : vector<2x8x1xf32> to vector<2x8x8xf32>
    %16 = arith.subf %12, %15 : vector<2x8x8xf32>
    %17 = math.exp %16 : vector<2x8x8xf32>
    %cst_11 = arith.constant dense<0.000000e+00> : vector<2x8xf32>
    %18 = vector.multi_reduction <add>, %17, %cst_11 [2] : vector<2x8x8xf32> to vector<2x8xf32>
    %19 = vector.shape_cast %18 : vector<2x8xf32> to vector<2x8x1xf32>
    %20 = tpu.reciprocal %19 {approx = true} : vector<2x8x1xf32> -> vector<2x8x1xf32>
    %21 = vector.broadcast %20 : vector<2x8x1xf32> to vector<2x8x8xf32>
    %22 = arith.mulf %17, %21 : vector<2x8x8xf32>
    "tpu.trace_start"() <{level = 10 : i32, message = "bqk,bkd->bqd"}> : () -> ()
    %cst_12 = arith.constant dense<0.000000e+00> : vector<2x8x8xf32>
    %23 = tpu.matmul %22, %11, %cst_12 {dimension_numbers = #tpu.dot_dimension_numbers<[2], [1], [1], [2], [0, 0, 0, 1, 1, 2], [0], [0]>} : vector<2x8x8xf32>, vector<2x8x8xf32>, vector<2x8x8xf32> -> vector<2x8x8xf32>
    "tpu.trace_stop"() : () -> ()
    %24 = vector.extract_strided_slice %9 {offsets = [0, 0, 8], sizes = [2, 8, 8], strides = [1, 1, 1]} : vector<2x8x32xf32> to vector<2x8x8xf32>
    %25 = vector.extract_strided_slice %7 {offsets = [0, 0, 8], sizes = [2, 8, 8], strides = [1, 1, 1]} : vector<2x8x32xf32> to vector<2x8x8xf32>
    "tpu.trace_start"() <{level = 10 : i32, message = "bqd,bkd->bqk"}> : () -> ()
    %cst_13 = arith.constant dense<0.000000e+00> : vector<2x8x8xf32>
    %26 = tpu.matmul %24, %25, %cst_13 {dimension_numbers = #tpu.dot_dimension_numbers<[2], [2], [1], [1], [0, 0, 0, 1, 1, 1], [0], [0]>} : vector<2x8x8xf32>, vector<2x8x8xf32>, vector<2x8x8xf32> -> vector<2x8x8xf32>
    "tpu.trace_stop"() : () -> ()
    %cst_14 = arith.constant dense<0xFF800000> : vector<2x8xf32>
    %27 = vector.multi_reduction <maximumf>, %26, %cst_14 [2] : vector<2x8x8xf32> to vector<2x8xf32>
    %28 = vector.shape_cast %27 : vector<2x8xf32> to vector<2x8x1xf32>
    %29 = vector.broadcast %28 : vector<2x8x1xf32> to vector<2x8x8xf32>
    %30 = arith.subf %26, %29 : vector<2x8x8xf32>
    %31 = math.exp %30 : vector<2x8x8xf32>
    %cst_15 = arith.constant dense<0.000000e+00> : vector<2x8xf32>
    %32 = vector.multi_reduction <add>, %31, %cst_15 [2] : vector<2x8x8xf32> to vector<2x8xf32>
    %33 = vector.shape_cast %32 : vector<2x8xf32> to vector<2x8x1xf32>
    %34 = tpu.reciprocal %33 {approx = true} : vector<2x8x1xf32> -> vector<2x8x1xf32>
    %35 = vector.broadcast %34 : vector<2x8x1xf32> to vector<2x8x8xf32>
    %36 = arith.mulf %31, %35 : vector<2x8x8xf32>
    "tpu.trace_start"() <{level = 10 : i32, message = "bqk,bkd->bqd"}> : () -> ()
    %cst_16 = arith.constant dense<0.000000e+00> : vector<2x8x8xf32>
    %37 = tpu.matmul %36, %25, %cst_16 {dimension_numbers = #tpu.dot_dimension_numbers<[2], [1], [1], [2], [0, 0, 0, 1, 1, 2], [0], [0]>} : vector<2x8x8xf32>, vector<2x8x8xf32>, vector<2x8x8xf32> -> vector<2x8x8xf32>
    "tpu.trace_stop"() : () -> ()
    %38 = vector.extract_strided_slice %9 {offsets = [0, 0, 16], sizes = [2, 8, 8], strides = [1, 1, 1]} : vector<2x8x32xf32> to vector<2x8x8xf32>
    %39 = vector.extract_strided_slice %7 {offsets = [0, 0, 16], sizes = [2, 8, 8], strides = [1, 1, 1]} : vector<2x8x32xf32> to vector<2x8x8xf32>
    "tpu.trace_start"() <{level = 10 : i32, message = "bqd,bkd->bqk"}> : () -> ()
    %cst_17 = arith.constant dense<0.000000e+00> : vector<2x8x8xf32>
    %40 = tpu.matmul %38, %39, %cst_17 {dimension_numbers = #tpu.dot_dimension_numbers<[2], [2], [1], [1], [0, 0, 0, 1, 1, 1], [0], [0]>} : vector<2x8x8xf32>, vector<2x8x8xf32>, vector<2x8x8xf32> -> vector<2x8x8xf32>
    "tpu.trace_stop"() : () -> ()
    %cst_18 = arith.constant dense<0xFF800000> : vector<2x8xf32>
    %41 = vector.multi_reduction <maximumf>, %40, %cst_18 [2] : vector<2x8x8xf32> to vector<2x8xf32>
    %42 = vector.shape_cast %41 : vector<2x8xf32> to vector<2x8x1xf32>
    %43 = vector.broadcast %42 : vector<2x8x1xf32> to vector<2x8x8xf32>
    %44 = arith.subf %40, %43 : vector<2x8x8xf32>
    %45 = math.exp %44 : vector<2x8x8xf32>
    %cst_19 = arith.constant dense<0.000000e+00> : vector<2x8xf32>
    %46 = vector.multi_reduction <add>, %45, %cst_19 [2] : vector<2x8x8xf32> to vector<2x8xf32>
    %47 = vector.shape_cast %46 : vector<2x8xf32> to vector<2x8x1xf32>
    %48 = tpu.reciprocal %47 {approx = true} : vector<2x8x1xf32> -> vector<2x8x1xf32>
    %49 = vector.broadcast %48 : vector<2x8x1xf32> to vector<2x8x8xf32>
    %50 = arith.mulf %45, %49 : vector<2x8x8xf32>
    "tpu.trace_start"() <{level = 10 : i32, message = "bqk,bkd->bqd"}> : () -> ()
    %cst_20 = arith.constant dense<0.000000e+00> : vector<2x8x8xf32>
    %51 = tpu.matmul %50, %39, %cst_20 {dimension_numbers = #tpu.dot_dimension_numbers<[2], [1], [1], [2], [0, 0, 0, 1, 1, 2], [0], [0]>} : vector<2x8x8xf32>, vector<2x8x8xf32>, vector<2x8x8xf32> -> vector<2x8x8xf32>
    "tpu.trace_stop"() : () -> ()
    %52 = vector.extract_strided_slice %9 {offsets = [0, 0, 24], sizes = [2, 8, 8], strides = [1, 1, 1]} : vector<2x8x32xf32> to vector<2x8x8xf32>
    %53 = vector.extract_strided_slice %7 {offsets = [0, 0, 24], sizes = [2, 8, 8], strides = [1, 1, 1]} : vector<2x8x32xf32> to vector<2x8x8xf32>
    "tpu.trace_start"() <{level = 10 : i32, message = "bqd,bkd->bqk"}> : () -> ()
    %cst_21 = arith.constant dense<0.000000e+00> : vector<2x8x8xf32>
    %54 = tpu.matmul %52, %53, %cst_21 {dimension_numbers = #tpu.dot_dimension_numbers<[2], [2], [1], [1], [0, 0, 0, 1, 1, 1], [0], [0]>} : vector<2x8x8xf32>, vector<2x8x8xf32>, vector<2x8x8xf32> -> vector<2x8x8xf32>
    "tpu.trace_stop"() : () -> ()
    %cst_22 = arith.constant dense<0xFF800000> : vector<2x8xf32>
    %55 = vector.multi_reduction <maximumf>, %54, %cst_22 [2] : vector<2x8x8xf32> to vector<2x8xf32>
    %56 = vector.shape_cast %55 : vector<2x8xf32> to vector<2x8x1xf32>
    %57 = vector.broadcast %56 : vector<2x8x1xf32> to vector<2x8x8xf32>
    %58 = arith.subf %54, %57 : vector<2x8x8xf32>
    %59 = math.exp %58 : vector<2x8x8xf32>
    %cst_23 = arith.constant dense<0.000000e+00> : vector<2x8xf32>
    %60 = vector.multi_reduction <add>, %59, %cst_23 [2] : vector<2x8x8xf32> to vector<2x8xf32>
    %61 = vector.shape_cast %60 : vector<2x8xf32> to vector<2x8x1xf32>
    %62 = tpu.reciprocal %61 {approx = true} : vector<2x8x1xf32> -> vector<2x8x1xf32>
    %63 = vector.broadcast %62 : vector<2x8x1xf32> to vector<2x8x8xf32>
    %64 = arith.mulf %59, %63 : vector<2x8x8xf32>
    "tpu.trace_start"() <{level = 10 : i32, message = "bqk,bkd->bqd"}> : () -> ()
    %cst_24 = arith.constant dense<0.000000e+00> : vector<2x8x8xf32>
    %65 = tpu.matmul %64, %53, %cst_24 {dimension_numbers = #tpu.dot_dimension_numbers<[2], [1], [1], [2], [0, 0, 0, 1, 1, 2], [0], [0]>} : vector<2x8x8xf32>, vector<2x8x8xf32>, vector<2x8x8xf32> -> vector<2x8x8xf32>
    "tpu.trace_stop"() : () -> ()
    %66 = tpu.concatenate %23, %37, %51, %65 in 2 : vector<2x8x8xf32>, vector<2x8x8xf32>, vector<2x8x8xf32>, vector<2x8x8xf32> -> vector<2x8x32xf32>
    %67 = vector.shape_cast %66 : vector<2x8x32xf32> to vector<16x32xf32>
    %c0_25 = arith.constant 0 : index
    %c0_26 = arith.constant 0 : index
    %c0_27 = arith.constant 0 : index
    %68 = vector.load %arg3[%c0_25, %c0_26, %c0_27] : memref<2x32x32xf32, #tpu.memory_space<vmem>>, vector<1x32x32xf32>
    %69 = vector.shape_cast %68 : vector<1x32x32xf32> to vector<32x32xf32>
    %cst_28 = arith.constant dense<0.000000e+00> : vector<16x32xf32>
    %70 = tpu.matmul %67, %69, %cst_28 {dimension_numbers = #tpu.dot_dimension_numbers<[1], [0], [0], [1], [0, 0, 1, 1], [], []>} : vector<16x32xf32>, vector<32x32xf32>, vector<16x32xf32> -> vector<16x32xf32>
    %c0_29 = arith.constant 0 : index
    %c0_30 = arith.constant 0 : index
    %c0_31 = arith.constant 0 : index
    %71 = vector.load %arg4[%c0_29, %c0_30, %c0_31] : memref<2x1x32xf32, #tpu.memory_space<vmem>>, vector<1x1x32xf32>
    %72 = vector.shape_cast %71 : vector<1x1x32xf32> to vector<1x32xf32>
    %73 = vector.broadcast %72 : vector<1x32xf32> to vector<16x32xf32>
    %74 = arith.addf %70, %73 : vector<16x32xf32>
    %c1 = arith.constant 1 : index
    %c0_32 = arith.constant 0 : index
    %c0_33 = arith.constant 0 : index
    %75 = vector.load %arg2[%c1, %c0_32, %c0_33] : memref<2x32x32xf32, #tpu.memory_space<vmem>>, vector<1x32x32xf32>
    %76 = vector.shape_cast %75 : vector<1x32x32xf32> to vector<32x32xf32>
    %cst_34 = arith.constant dense<0.000000e+00> : vector<16x32xf32>
    %77 = tpu.matmul %74, %76, %cst_34 {dimension_numbers = #tpu.dot_dimension_numbers<[1], [0], [0], [1], [0, 0, 1, 1], [], []>} : vector<16x32xf32>, vector<32x32xf32>, vector<16x32xf32> -> vector<16x32xf32>
    %78 = vector.shape_cast %77 : vector<16x32xf32> to vector<2x8x32xf32>
    %cst_35 = arith.constant 0.353553385 : f32
    %79 = vector.broadcast %cst_35 : f32 to vector<2x8x32xf32>
    %80 = arith.mulf %78, %79 : vector<2x8x32xf32>
    %81 = vector.extract_strided_slice %80 {offsets = [0, 0, 0], sizes = [2, 8, 8], strides = [1, 1, 1]} : vector<2x8x32xf32> to vector<2x8x8xf32>
    %82 = vector.extract_strided_slice %78 {offsets = [0, 0, 0], sizes = [2, 8, 8], strides = [1, 1, 1]} : vector<2x8x32xf32> to vector<2x8x8xf32>
    "tpu.trace_start"() <{level = 10 : i32, message = "bqd,bkd->bqk"}> : () -> ()
    %cst_36 = arith.constant dense<0.000000e+00> : vector<2x8x8xf32>
    %83 = tpu.matmul %81, %82, %cst_36 {dimension_numbers = #tpu.dot_dimension_numbers<[2], [2], [1], [1], [0, 0, 0, 1, 1, 1], [0], [0]>} : vector<2x8x8xf32>, vector<2x8x8xf32>, vector<2x8x8xf32> -> vector<2x8x8xf32>
    "tpu.trace_stop"() : () -> ()
    %cst_37 = arith.constant dense<0xFF800000> : vector<2x8xf32>
    %84 = vector.multi_reduction <maximumf>, %83, %cst_37 [2] : vector<2x8x8xf32> to vector<2x8xf32>
    %85 = vector.shape_cast %84 : vector<2x8xf32> to vector<2x8x1xf32>
    %86 = vector.broadcast %85 : vector<2x8x1xf32> to vector<2x8x8xf32>
    %87 = arith.subf %83, %86 : vector<2x8x8xf32>
    %88 = math.exp %87 : vector<2x8x8xf32>
    %cst_38 = arith.constant dense<0.000000e+00> : vector<2x8xf32>
    %89 = vector.multi_reduction <add>, %88, %cst_38 [2] : vector<2x8x8xf32> to vector<2x8xf32>
    %90 = vector.shape_cast %89 : vector<2x8xf32> to vector<2x8x1xf32>
    %91 = tpu.reciprocal %90 {approx = true} : vector<2x8x1xf32> -> vector<2x8x1xf32>
    %92 = vector.broadcast %91 : vector<2x8x1xf32> to vector<2x8x8xf32>
    %93 = arith.mulf %88, %92 : vector<2x8x8xf32>
    "tpu.trace_start"() <{level = 10 : i32, message = "bqk,bkd->bqd"}> : () -> ()
    %cst_39 = arith.constant dense<0.000000e+00> : vector<2x8x8xf32>
    %94 = tpu.matmul %93, %82, %cst_39 {dimension_numbers = #tpu.dot_dimension_numbers<[2], [1], [1], [2], [0, 0, 0, 1, 1, 2], [0], [0]>} : vector<2x8x8xf32>, vector<2x8x8xf32>, vector<2x8x8xf32> -> vector<2x8x8xf32>
    "tpu.trace_stop"() : () -> ()
    %95 = vector.extract_strided_slice %80 {offsets = [0, 0, 8], sizes = [2, 8, 8], strides = [1, 1, 1]} : vector<2x8x32xf32> to vector<2x8x8xf32>
    %96 = vector.extract_strided_slice %78 {offsets = [0, 0, 8], sizes = [2, 8, 8], strides = [1, 1, 1]} : vector<2x8x32xf32> to vector<2x8x8xf32>
    "tpu.trace_start"() <{level = 10 : i32, message = "bqd,bkd->bqk"}> : () -> ()
    %cst_40 = arith.constant dense<0.000000e+00> : vector<2x8x8xf32>
    %97 = tpu.matmul %95, %96, %cst_40 {dimension_numbers = #tpu.dot_dimension_numbers<[2], [2], [1], [1], [0, 0, 0, 1, 1, 1], [0], [0]>} : vector<2x8x8xf32>, vector<2x8x8xf32>, vector<2x8x8xf32> -> vector<2x8x8xf32>
    "tpu.trace_stop"() : () -> ()
    %cst_41 = arith.constant dense<0xFF800000> : vector<2x8xf32>
    %98 = vector.multi_reduction <maximumf>, %97, %cst_41 [2] : vector<2x8x8xf32> to vector<2x8xf32>
    %99 = vector.shape_cast %98 : vector<2x8xf32> to vector<2x8x1xf32>
    %100 = vector.broadcast %99 : vector<2x8x1xf32> to vector<2x8x8xf32>
    %101 = arith.subf %97, %100 : vector<2x8x8xf32>
    %102 = math.exp %101 : vector<2x8x8xf32>
    %cst_42 = arith.constant dense<0.000000e+00> : vector<2x8xf32>
    %103 = vector.multi_reduction <add>, %102, %cst_42 [2] : vector<2x8x8xf32> to vector<2x8xf32>
    %104 = vector.shape_cast %103 : vector<2x8xf32> to vector<2x8x1xf32>
    %105 = tpu.reciprocal %104 {approx = true} : vector<2x8x1xf32> -> vector<2x8x1xf32>
    %106 = vector.broadcast %105 : vector<2x8x1xf32> to vector<2x8x8xf32>
    %107 = arith.mulf %102, %106 : vector<2x8x8xf32>
    "tpu.trace_start"() <{level = 10 : i32, message = "bqk,bkd->bqd"}> : () -> ()
    %cst_43 = arith.constant dense<0.000000e+00> : vector<2x8x8xf32>
    %108 = tpu.matmul %107, %96, %cst_43 {dimension_numbers = #tpu.dot_dimension_numbers<[2], [1], [1], [2], [0, 0, 0, 1, 1, 2], [0], [0]>} : vector<2x8x8xf32>, vector<2x8x8xf32>, vector<2x8x8xf32> -> vector<2x8x8xf32>
    "tpu.trace_stop"() : () -> ()
    %109 = vector.extract_strided_slice %80 {offsets = [0, 0, 16], sizes = [2, 8, 8], strides = [1, 1, 1]} : vector<2x8x32xf32> to vector<2x8x8xf32>
    %110 = vector.extract_strided_slice %78 {offsets = [0, 0, 16], sizes = [2, 8, 8], strides = [1, 1, 1]} : vector<2x8x32xf32> to vector<2x8x8xf32>
    "tpu.trace_start"() <{level = 10 : i32, message = "bqd,bkd->bqk"}> : () -> ()
    %cst_44 = arith.constant dense<0.000000e+00> : vector<2x8x8xf32>
    %111 = tpu.matmul %109, %110, %cst_44 {dimension_numbers = #tpu.dot_dimension_numbers<[2], [2], [1], [1], [0, 0, 0, 1, 1, 1], [0], [0]>} : vector<2x8x8xf32>, vector<2x8x8xf32>, vector<2x8x8xf32> -> vector<2x8x8xf32>
    "tpu.trace_stop"() : () -> ()
    %cst_45 = arith.constant dense<0xFF800000> : vector<2x8xf32>
    %112 = vector.multi_reduction <maximumf>, %111, %cst_45 [2] : vector<2x8x8xf32> to vector<2x8xf32>
    %113 = vector.shape_cast %112 : vector<2x8xf32> to vector<2x8x1xf32>
    %114 = vector.broadcast %113 : vector<2x8x1xf32> to vector<2x8x8xf32>
    %115 = arith.subf %111, %114 : vector<2x8x8xf32>
    %116 = math.exp %115 : vector<2x8x8xf32>
    %cst_46 = arith.constant dense<0.000000e+00> : vector<2x8xf32>
    %117 = vector.multi_reduction <add>, %116, %cst_46 [2] : vector<2x8x8xf32> to vector<2x8xf32>
    %118 = vector.shape_cast %117 : vector<2x8xf32> to vector<2x8x1xf32>
    %119 = tpu.reciprocal %118 {approx = true} : vector<2x8x1xf32> -> vector<2x8x1xf32>
    %120 = vector.broadcast %119 : vector<2x8x1xf32> to vector<2x8x8xf32>
    %121 = arith.mulf %116, %120 : vector<2x8x8xf32>
    "tpu.trace_start"() <{level = 10 : i32, message = "bqk,bkd->bqd"}> : () -> ()
    %cst_47 = arith.constant dense<0.000000e+00> : vector<2x8x8xf32>
    %122 = tpu.matmul %121, %110, %cst_47 {dimension_numbers = #tpu.dot_dimension_numbers<[2], [1], [1], [2], [0, 0, 0, 1, 1, 2], [0], [0]>} : vector<2x8x8xf32>, vector<2x8x8xf32>, vector<2x8x8xf32> -> vector<2x8x8xf32>
    "tpu.trace_stop"() : () -> ()
    %123 = vector.extract_strided_slice %80 {offsets = [0, 0, 24], sizes = [2, 8, 8], strides = [1, 1, 1]} : vector<2x8x32xf32> to vector<2x8x8xf32>
    %124 = vector.extract_strided_slice %78 {offsets = [0, 0, 24], sizes = [2, 8, 8], strides = [1, 1, 1]} : vector<2x8x32xf32> to vector<2x8x8xf32>
    "tpu.trace_start"() <{level = 10 : i32, message = "bqd,bkd->bqk"}> : () -> ()
    %cst_48 = arith.constant dense<0.000000e+00> : vector<2x8x8xf32>
    %125 = tpu.matmul %123, %124, %cst_48 {dimension_numbers = #tpu.dot_dimension_numbers<[2], [2], [1], [1], [0, 0, 0, 1, 1, 1], [0], [0]>} : vector<2x8x8xf32>, vector<2x8x8xf32>, vector<2x8x8xf32> -> vector<2x8x8xf32>
    "tpu.trace_stop"() : () -> ()
    %cst_49 = arith.constant dense<0xFF800000> : vector<2x8xf32>
    %126 = vector.multi_reduction <maximumf>, %125, %cst_49 [2] : vector<2x8x8xf32> to vector<2x8xf32>
    %127 = vector.shape_cast %126 : vector<2x8xf32> to vector<2x8x1xf32>
    %128 = vector.broadcast %127 : vector<2x8x1xf32> to vector<2x8x8xf32>
    %129 = arith.subf %125, %128 : vector<2x8x8xf32>
    %130 = math.exp %129 : vector<2x8x8xf32>
    %cst_50 = arith.constant dense<0.000000e+00> : vector<2x8xf32>
    %131 = vector.multi_reduction <add>, %130, %cst_50 [2] : vector<2x8x8xf32> to vector<2x8xf32>
    %132 = vector.shape_cast %131 : vector<2x8xf32> to vector<2x8x1xf32>
    %133 = tpu.reciprocal %132 {approx = true} : vector<2x8x1xf32> -> vector<2x8x1xf32>
    %134 = vector.broadcast %133 : vector<2x8x1xf32> to vector<2x8x8xf32>
    %135 = arith.mulf %130, %134 : vector<2x8x8xf32>
    "tpu.trace_start"() <{level = 10 : i32, message = "bqk,bkd->bqd"}> : () -> ()
    %cst_51 = arith.constant dense<0.000000e+00> : vector<2x8x8xf32>
    %136 = tpu.matmul %135, %124, %cst_51 {dimension_numbers = #tpu.dot_dimension_numbers<[2], [1], [1], [2], [0, 0, 0, 1, 1, 2], [0], [0]>} : vector<2x8x8xf32>, vector<2x8x8xf32>, vector<2x8x8xf32> -> vector<2x8x8xf32>
    "tpu.trace_stop"() : () -> ()
    %137 = tpu.concatenate %94, %108, %122, %136 in 2 : vector<2x8x8xf32>, vector<2x8x8xf32>, vector<2x8x8xf32>, vector<2x8x8xf32> -> vector<2x8x32xf32>
    %138 = vector.shape_cast %137 : vector<2x8x32xf32> to vector<16x32xf32>
    %c1_52 = arith.constant 1 : index
    %c0_53 = arith.constant 0 : index
    %c0_54 = arith.constant 0 : index
    %139 = vector.load %arg3[%c1_52, %c0_53, %c0_54] : memref<2x32x32xf32, #tpu.memory_space<vmem>>, vector<1x32x32xf32>
    %140 = vector.shape_cast %139 : vector<1x32x32xf32> to vector<32x32xf32>
    %cst_55 = arith.constant dense<0.000000e+00> : vector<16x32xf32>
    %141 = tpu.matmul %138, %140, %cst_55 {dimension_numbers = #tpu.dot_dimension_numbers<[1], [0], [0], [1], [0, 0, 1, 1], [], []>} : vector<16x32xf32>, vector<32x32xf32>, vector<16x32xf32> -> vector<16x32xf32>
    %c1_56 = arith.constant 1 : index
    %c0_57 = arith.constant 0 : index
    %c0_58 = arith.constant 0 : index
    %142 = vector.load %arg4[%c1_56, %c0_57, %c0_58] : memref<2x1x32xf32, #tpu.memory_space<vmem>>, vector<1x1x32xf32>
    %143 = vector.shape_cast %142 : vector<1x1x32xf32> to vector<1x32xf32>
    %144 = vector.broadcast %143 : vector<1x32xf32> to vector<16x32xf32>
    %145 = arith.addf %141, %144 : vector<16x32xf32>
    %cst_59 = arith.constant dense<0.000000e+00> : vector<16xf32>
    %146 = vector.multi_reduction <add>, %145, %cst_59 [1] : vector<16x32xf32> to vector<16xf32>
    %147 = vector.shape_cast %146 : vector<16xf32> to vector<16x1xf32>
    %cst_60 = arith.constant 3.200000e+01 : f32
    %148 = vector.broadcast %cst_60 : f32 to vector<16x1xf32>
    %149 = arith.divf %147, %148 : vector<16x1xf32>
    %150 = vector.broadcast %149 : vector<16x1xf32> to vector<16x32xf32>
    %151 = arith.subf %145, %150 : vector<16x32xf32>
    %152 = arith.mulf %151, %151 : vector<16x32xf32>
    %cst_61 = arith.constant dense<0.000000e+00> : vector<16xf32>
    %153 = vector.multi_reduction <add>, %152, %cst_61 [1] : vector<16x32xf32> to vector<16xf32>
    %154 = vector.shape_cast %153 : vector<16xf32> to vector<16x1xf32>
    %cst_62 = arith.constant 3.200000e+01 : f32
    %155 = vector.broadcast %cst_62 : f32 to vector<16x1xf32>
    %156 = arith.divf %154, %155 : vector<16x1xf32>
    %157 = vector.broadcast %149 : vector<16x1xf32> to vector<16x32xf32>
    %158 = arith.subf %145, %157 : vector<16x32xf32>
    %cst_63 = arith.constant 9.99999974E-6 : f32
    %159 = vector.broadcast %cst_63 : f32 to vector<16x1xf32>
    %160 = arith.addf %156, %159 : vector<16x1xf32>
    %161 = math.rsqrt %160 : vector<16x1xf32>
    %162 = vector.broadcast %161 : vector<16x1xf32> to vector<16x32xf32>
    %163 = arith.mulf %158, %162 : vector<16x32xf32>
    %c0_64 = arith.constant 0 : index
    %c0_65 = arith.constant 0 : index
    %164 = vector.load %arg5[%c0_64, %c0_65] : memref<1x32xf32, #tpu.memory_space<vmem>>, vector<1x32xf32>
    %165 = vector.broadcast %164 : vector<1x32xf32> to vector<16x32xf32>
    %166 = arith.mulf %163, %165 : vector<16x32xf32>
    %c0_66 = arith.constant 0 : index
    %c0_67 = arith.constant 0 : index
    %167 = vector.load %arg6[%c0_66, %c0_67] : memref<1x32xf32, #tpu.memory_space<vmem>>, vector<1x32xf32>
    %168 = vector.broadcast %167 : vector<1x32xf32> to vector<16x32xf32>
    %169 = arith.addf %166, %168 : vector<16x32xf32>
    %170 = vector.shape_cast %169 : vector<16x32xf32> to vector<2x8x32xf32>
    %c0_68 = arith.constant 0 : index
    %c0_69 = arith.constant 0 : index
    %c0_70 = arith.constant 0 : index
    %171 = vector.load %arg7[%c0_68, %c0_69, %c0_70] : memref<2x8x32xf32, #tpu.memory_space<vmem>>, vector<2x8x32xf32>
    tpu.vector_store %arg7[%c0_68, %c0_69, %c0_70], %170 {strides = array<i32>} : memref<2x8x32xf32, #tpu.memory_space<vmem>>, vector<2x8x32xf32>,
    return
  }
}

</mosaic_0001>

<bundles_post_ra>
// kernel: tpu_custom_call.1
= control target key start
LH: loop header
LB: loop body
LE: loop exit
PB: predicated region body
PF: predicated region fallthrough
CT: control target
= control target key end

     0   :  { %12 = vsyncpa [#allocation3], 0  ;;  %s4234_s0 = inlined_call_operand.hbm [shape: f32[2,8,32], index: 0, kind: input, shape index: {}]   ;;  %s4235_s1 = inlined_call_operand.hbm [shape: f32[32,32], index: 1, kind: input, shape index: {}]   ;;  %s4236_s2 = inlined_call_operand.hbm [shape: f32[2,32,32], index: 2, kind: input, shape index: {}]   ;;  %s4237_s3 = inlined_call_operand.hbm [shape: f32[2,32,32], index: 3, kind: input, shape index: {}]   ;;  %s4238_s4 = inlined_call_operand.vmem [shape: f32[2,1,32], index: 4, kind: input, shape index: {}]   ;;  %s4239_s5 = inlined_call_operand.vmem [shape: f32[1,32], index: 5, kind: input, shape index: {}]   ;;  %s4240_s6 = inlined_call_operand.vmem [shape: f32[1,32], index: 6, kind: input, shape index: {}]   ;;  %s4241_s7 = inlined_call_operand.hbm [shape: f32[2,8,32], index: 7, kind: output, shape index: {}]  }
   0x1   :  { %13 = vsyncpa [#allocation6], 0 }
   0x2   :  { %14 = vsyncpa [#allocation9], 0 }
   0x3   :  { %15 = vsyncpa [#allocation4], 0  ;;  %s3818_s24 = smov [#allocation5]   ;;  %s3819_s26 = smov [#allocation2]  }
   0x4   :  { %s33_s25 = sshll.u32 %s3818_s24, 4  ;;  %s21_s27 = sshll.u32 %s3819_s26, 4  ;;  %s34_s25 = int_to_ptr.vmem [resolvable:$true] %s33_s25  ;;  %s22_s27 = int_to_ptr.vmem [resolvable:$true] %s21_s27 }
   0x5   :  { %s3718_s28 = scalar_lea.vmem %s34_s25, 512  ;;  %p3723_p1 = scmp.lt.s32.totalorder %s34_s25, %s34_s25 }
   0x6   :  { %p3719_p0 = scmp.ne.s32.totalorder %s34_s25, %s3718_s28  ;;  %p3724_p2 = scmp.lt.s32.totalorder %s3718_s28, %s3718_s28 }
   0x8   :  { %p3725_p3 = por %p3724_p2, %p3723_p1 }
   0xa   :  { %p3726_p4 = pnand %p3725_p3, %p3719_p0 }
   0xc   :  { %3729 = shalt.err (!%p3726_p4)
}
   0xd   :  { %s3820_s29 = smov 128   ;;  %s3821_s30 = smov 8  }
   0xe   :  { %39 = dma.hbm_to_vmem [thread:$0]  %s4235_s1, 512, %s34_s25, [#allocation6], %s3820_s29, %s3820_s29, %s3821_s30  }
   0xf   :  { %s3738_s10 = scalar_lea.vmem %s22_s27, 256  ;;  %p3743_p6 = scmp.lt.s32.totalorder %s22_s27, %s22_s27 }
  0x10   :  { %p3739_p5 = scmp.ne.s32.totalorder %s22_s27, %s3738_s10  ;;  %p3744_p7 = scmp.lt.s32.totalorder %s3738_s10, %s3738_s10 }
  0x12   :  { %p3745_p8 = por %p3744_p7, %p3743_p6 }
  0x14   :  { %p3746_p9 = pnand %p3745_p8, %p3739_p5 }
  0x16   :  { %3749 = shalt.err (!%p3746_p9)
}
  0x17   :  { %27 = dma.hbm_to_vmem [thread:$0]  %s4234_s0, 256, %s22_s27, [#allocation3], %s3820_s29, %s3820_s29, %s3821_s30  }
  0x18   :  { %s3822_s13 = smov [#allocation7]   ;;  %s3823_s15 = smov [#allocation8]  }
  0x19   :  { %s45_s14 = sshll.u32 %s3822_s13, 4  ;;  %s57_s16 = sshll.u32 %s3823_s15, 4  ;;  %s46_s14 = int_to_ptr.vmem [resolvable:$true] %s45_s14  ;;  %s58_s16 = int_to_ptr.vmem [resolvable:$true] %s57_s16 }
  0x1a   :  { %s3758_s1 = scalar_lea.vmem %s46_s14, 1024  ;;  %p3763_p11 = scmp.lt.s32.totalorder %s46_s14, %s46_s14 }
  0x1b   :  { %p3759_p10 = scmp.ne.s32.totalorder %s46_s14, %s3758_s1  ;;  %p3764_p12 = scmp.lt.s32.totalorder %s3758_s1, %s3758_s1 }
  0x1d   :  { %p3765_p13 = por %p3764_p12, %p3763_p11 }
  0x1f   :  { %p3766_p0 = pnand %p3765_p13, %p3759_p10 }
  0x21   :  { %3769 = shalt.err (!%p3766_p0)
}
  0x22   :  { %51 = dma.hbm_to_vmem [thread:$0]  %s4236_s2, 1024, %s46_s14, [#allocation6], %s3820_s29, %s3820_s29, %s3821_s30  }
  0x23   :  { %s3778_s0 = scalar_lea.vmem %s58_s16, 1024  ;;  %p3783_p2 = scmp.lt.s32.totalorder %s58_s16, %s58_s16 }
  0x24   :  { %p3779_p1 = scmp.ne.s32.totalorder %s58_s16, %s3778_s0  ;;  %p3784_p3 = scmp.lt.s32.totalorder %s3778_s0, %s3778_s0 }
  0x26   :  { %p3785_p4 = por %p3784_p3, %p3783_p2 }
  0x28   :  { %p3786_p5 = pnand %p3785_p4, %p3779_p1 }
  0x2a   :  { %3789 = shalt.err (!%p3786_p5)
}
  0x2b   :  { %63 = dma.hbm_to_vmem [thread:$0]  %s4237_s3, 1024, %s58_s16, [#allocation9], %s3820_s29, %s3820_s29, %s3821_s30  }
  0x2c   :  { %3810 = dma.done.wait [#allocation3], 256  }
  0x2d   :  { %3811 = vsyncadd [#allocation3], 4294967040 }
  0x2e   :  { %3812 = dma.done.wait [#allocation6], 1536  }
  0x2f   :  { %3813 = vsyncadd [#allocation6], 4294965760 }
  0x30   :  { %3814 = dma.done.wait [#allocation9], 1024  }
  0x31   :  { %3815 = vsyncadd [#allocation9], 4294966272  ;;  %vm88_vm0 = vcmask 261120   ;;  %v87_v0 = vld [vmem:[#allocation5 + $0x18] sm:$0xff]  ;;  %v86_v1 = vld [vmem:[#allocation5 + $0x10] sm:$0xff]  ;;  %v3824_v12 = vmov 0.0  }
  0x32   :  { %3413 = vmatprep.subr.mxu0 %v87_v0  ;;  %v82_v2 = vld [vmem:[#allocation2] sm:$0xff]  ;;  %v85_v3 = vld [vmem:[#allocation5 + $0x8] sm:$0xff]  ;;  %v173_v4 = vld [vmem:[#allocation7 + $0x18] sm:$0xff]  ;;  %vm3825_vm1 = vmmov 0   ;;  %vm257_vm2 = vcmask 64512   ;;  %s3826_s2 = smov 120  }
  0x33   :  { %3414 = vmatpush3.msra.mxu0 %v87_v0  ;;  %3421 = vmatprep.mubr.msk.f32.mxu0 %vm88_vm0, %v82_v2  ;;  %v172_v5 = vld [vmem:[#allocation7 + $0x10] sm:$0xff]  ;;  %v84_v6 = vld [vmem:[#allocation5] sm:$0xff]  ;;  %v83_v7 = vld [vmem:[#allocation2 + $0x8] sm:$0xff]  ;;  %s3827_s3 = smov 112   ;;  %s3828_s21 = smov 104   ;;  %vm1585_vm3 = vcmask 195584  }
  0x34   :  { %3415 = vmatprep.subr.mxu0 %v86_v1  ;;  %3424 = vmatprep.subr.mxu1 %v173_v4  ;;  %v171_v8 = vld [vmem:[#allocation7 + $0x8] sm:$0xff]  ;;  %v170_v9 = vld [vmem:[#allocation7] sm:$0xff]  ;;  %s3829_s22 = smov 16   ;;  %s3830_s23 = smov 24   ;;  %vm1582_vm4 = vcmask 130048  }
  0x35   :  { %3416 = vmatpush3.msra.mxu0 %v86_v1  ;;  %3425 = vmatpush3.msra.mxu1 %v173_v4  ;;  %s3831_s10 = smov [#allocation10]  }
  0x36   :  { %3417 = vmatprep.subr.mxu0 %v85_v3  ;;  %3426 = vmatprep.subr.mxu1 %v172_v5  ;;  %s3242_s11 = sshll.u32 %s3831_s10, 4  ;;  %s3243_s11 = int_to_ptr.vmem [resolvable:$true] %s3242_s11 }
  0x37   :  { %3418 = vmatpush3.msra.mxu0 %v85_v3  ;;  %3427 = vmatpush3.msra.mxu1 %v172_v5  ;;  %s3790_s12 = scalar_lea.vmem %s3243_s11, 256  ;;  %p3795_p7 = scmp.lt.s32.totalorder %s3243_s11, %s3243_s11 }
  0x38   :  { %3419 = vmatprep.subr.mxu0 %v84_v6  ;;  %3428 = vmatprep.subr.mxu1 %v171_v8  ;;  %p3791_p6 = scmp.ne.s32.totalorder %s3243_s11, %s3790_s12  ;;  %p3796_p8 = scmp.lt.s32.totalorder %s3790_s12, %s3790_s12 }
  0x39   :  { %3420 = vmatpush3.msra.mxu0 %v84_v6  ;;  %3429 = vmatpush3.msra.mxu1 %v171_v8 }
  0x3a   :  { %3422 = vmatmul.mubr.msk.f32.vlgmr.msra.gmra.mxu0 %vm88_vm0, %v83_v7  ;;  %3430 = vmatprep.subr.mxu1 %v170_v9  ;;  %p3797_p9 = por %p3796_p8, %p3795_p7 }
  0x3b   :  { %3431 = vmatpush3.msra.mxu1 %v170_v9  ;;  %3445 = vmatprep.subr.mxu0 %v3824_v12 }
  0x3c   :  { %3435 = vmatprep.subr.mxu1 %v3824_v12  ;;  %3447 = vmatprep.mubr.msk.f32.mxu0 %vm3825_vm1, %v3824_v12  ;;  %p3798_p10 = pnand %p3797_p9, %p3791_p6 }
  0xfa   :  { %v3423_v10 = vpop.f32.mrf.mxu0 }
  0xfc   :  { %v161_v11 = vpop.f32.mrf.mxu0 }
  0xfd   :  { %3432 = vmatprep.mubr.msk.f32.mxu1 %vm88_vm0, %v161_v11 }
  0xfe   :  { %3433 = vmatmul.mubr.msk.f32.vlgmr.msra.gmra.mxu1 %vm88_vm0, %v3423_v10 }
  0xff   :  { %3437 = vmatprep.mubr.msk.f32.mxu1 %vm3825_vm1, %v3824_v12 }
 0x1be   :  { %v3906_v13 = vpop.f32.mrf.mxu1 }
 0x1bf   :  { %658 = vrot.lane.b32.xlu1 %v3906_v13, %s3826_s2  ;;  %v3929_v16 = vmul.f32 0.35355338, %v3906_v13 }
 0x1c0   :  { %v3910_v14 = vpop.f32.mrf.mxu1 }
 0x1c1   :  { %3436 = vmatpush3.xpose.msk.msra.mxu1 %vm257_vm2, %v3910_v14  ;;  %3446 = vmatpush3.msra.mxu0 %v3910_v14  ;;  %v3916_v15 = vmul.f32 0.35355338, %v3910_v14 }
 0x1c2   :  { %3440 = vmatprep.subr.mxu1 %v3824_v12  ;;  %3455 = vmatprep.subr.mxu0 %v3824_v12 }
 0x1c3   :  { %578 = vrot.lane.b32.xlu1 %v3916_v15, %s3826_s2 }
 0x1c4   :  { %3438 = vmatmul.mubr.msk.f32.vlgmr.msra.gmra.mxu1 %vm257_vm2, %v3916_v15 }
 0x1c5   :  { %3441 = vmatpush3.xpose.msk.msra.mxu1 %vm257_vm2, %v3906_v13  ;;  %3442 = vmatprep.mubr.msk.f32.mxu1 %vm3825_vm1, %v3824_v12 }
 0x1c6   :  { %3450 = vmatprep.subr.mxu1 %v3824_v12 }
 0x1c8   :  { %3443 = vmatmul.mubr.msk.f32.vlgmr.msra.gmra.mxu1 %vm257_vm2, %v3929_v16 }
 0x1c9   :  { %3451 = vmatpush3.msra.mxu1 %v3906_v13  ;;  %3452 = vmatprep.mubr.msk.f32.mxu1 %vm3825_vm1, %v3824_v12 }
 0x1ca   :  { %3460 = vmatprep.subr.mxu1 %v3824_v12 }
 0x231   :  { %v659_v33 = vpop.permute.xlu1 %658 }
 0x235   :  { %v579_v34 = vpop.permute.xlu1 %578 }
 0x284   :  { %v330_v17 = vpop.f32.mrf.mxu1 }
 0x285   :  { %v410_v18 = vsel %vm257_vm2, %v330_v17, -inf }
 0x286   :  { %411 = vmax.xlane.f32.xlu0 %v410_v18  ;;  %v3439_v19 = vpop.f32.mrf.mxu1 }
 0x288   :  { %v406_v20 = vpop.f32.mrf.mxu1 }
 0x289   :  { %v413_v21 = vsel %vm257_vm2, %v406_v20, -inf }
 0x28a   :  { %414 = vmax.xlane.f32.xlu0 %v413_v21  ;;  %v3444_v22 = vpop.f32.mrf.mxu1 }
 0x2a0   :  { %580 = vrot.lane.b32.xlu0 %v3910_v14, %s3826_s2 }
 0x30f   :  { %v412_v23 = vpop.xlane.xlu0 %411 }
 0x310   :  { %v416_v24 = vsub.f32 %v330_v17, %v412_v23 }
 0x312   :  { %v418_v25 = vmul.f32 1.442695, %v416_v24 }
 0x313   :  { %v415_v26 = vpop.xlane.xlu0 %414 }
 0x314   :  { %3642 = vpow2.f32 %v418_v25  ;;  %v417_v27 = vsub.f32 %v406_v20, %v415_v26 }
 0x316   :  { %v420_v28 = vmul.f32 1.442695, %v417_v27 }
 0x317   :  { %v581_v39 = vpop.permute.xlu0 %580 }
 0x318   :  { %3644 = vpow2.f32 %v420_v28 }
 0x321   :  { %v3643_v29 = vpop.eup %3642 }
 0x322   :  { %v422_v30 = vsel %vm257_vm2, %v3643_v29, 0.0 }
 0x323   :  { %423 = vadd.xlane.f32.xlu1 %v422_v30 }
 0x325   :  { %v3645_v31 = vpop.eup %3644 }
 0x326   :  { %v425_v32 = vsel %vm257_vm2, %v3645_v31, 0.0 }
 0x327   :  { %426 = vadd.xlane.f32.xlu1 %v425_v32 }
 0x338   :  { %656 = vrot.lane.b32.xlu1 %v3929_v16, %s3826_s2 }
 0x3ac   :  { %v424_v35 = vpop.xlane.xlu1 %423 }
 0x3ad   :  { %3646 = vrcp.f32 %v424_v35 }
 0x3b0   :  { %v427_v36 = vpop.xlane.xlu1 %426 }
 0x3b1   :  { %3648 = vrcp.f32 %v427_v36 }
 0x3b4   :  { %v657_v42 = vpop.permute.xlu1 %656 }
 0x3ba   :  { %v3647_v37 = vpop.eup %3646 }
 0x3bb   :  { %v430_v38 = vmul.f32 %v3647_v37, %v3643_v29 }
 0x3bd   :  { %3448 = vmatmul.mubr.msk.f32.vlgmr.msra.gmra.mxu0 %vm257_vm2, %v430_v38 }
 0x3be   :  { %v3649_v40 = vpop.eup %3648  ;;  %3456 = vmatpush3.xpose.msk.msra.mxu0 %vm257_vm2, %v581_v39  ;;  %3457 = vmatprep.mubr.msk.f32.mxu0 %vm3825_vm1, %v3824_v12 }
 0x3bf   :  { %3465 = vmatprep.subr.mxu0 %v3824_v12  ;;  %v431_v41 = vmul.f32 %v3649_v40, %v3645_v31 }
 0x3c1   :  { %3453 = vmatmul.mubr.msk.f32.vlgmr.msra.gmra.mxu1 %vm257_vm2, %v431_v41  ;;  %3458 = vmatmul.mubr.msk.f32.vlgmr.msra.gmra.mxu0 %vm257_vm2, %v579_v34 }
 0x3c2   :  { %3461 = vmatpush3.xpose.msk.msra.mxu1 %vm257_vm2, %v659_v33  ;;  %3466 = vmatpush3.msra.mxu0 %v581_v39 }
 0x3c3   :  { %3462 = vmatprep.mubr.msk.f32.mxu1 %vm3825_vm1, %v3824_v12  ;;  %3470 = vmatprep.subr.mxu1 %v3824_v12 }
 0x3c4   :  { %3467 = vmatprep.mubr.msk.f32.mxu0 %vm3825_vm1, %v3824_v12  ;;  %3475 = vmatprep.subr.mxu0 %v3824_v12 }
 0x3c5   :  { %3463 = vmatmul.mubr.msk.f32.vlgmr.msra.gmra.mxu1 %vm257_vm2, %v657_v42 }
 0x3c6   :  { %3471 = vmatpush3.msra.mxu1 %v659_v33  ;;  %3472 = vmatprep.mubr.msk.f32.mxu1 %vm3825_vm1, %v3824_v12 }
 0x3c7   :  { %3480 = vmatprep.subr.mxu1 %v3824_v12 }
 0x47d   :  { %v3964_v43 = vpop.f32.mrf.mxu0 }
 0x47f   :  { %v3449_v44 = vpop.f32.mrf.mxu0 }
 0x481   :  { %v3966_v45 = vpop.f32.mrf.mxu1  ;;  %v652_v46 = vpop.f32.mrf.mxu0 }
 0x482   :  { %v734_v47 = vsel %vm257_vm2, %v652_v46, -inf }
 0x483   :  { %735 = vmax.xlane.f32.xlu0 %v734_v47  ;;  %v3454_v48 = vpop.f32.mrf.mxu1  ;;  %v3459_v49 = vpop.f32.mrf.mxu0 }
 0x485   :  { %v730_v50 = vpop.f32.mrf.mxu1 }
 0x486   :  { %v737_v51 = vsel %vm257_vm2, %v730_v50, -inf }
 0x487   :  { %738 = vmax.xlane.f32.xlu1 %v737_v51  ;;  %v3464_v52 = vpop.f32.mrf.mxu1 }
 0x498   :  { %984 = vrot.lane.b32.xlu1 %v3906_v13, %s3827_s3 }
 0x49c   :  { %904 = vrot.lane.b32.xlu1 %v3916_v15, %s3827_s3 }
 0x4a0   :  { %982 = vrot.lane.b32.xlu1 %v3929_v16, %s3827_s3 }
 0x50c   :  { %v736_v53 = vpop.xlane.xlu0 %735 }
 0x50d   :  { %v740_v54 = vsub.f32 %v652_v46, %v736_v53 }
 0x50f   :  { %v742_v55 = vmul.f32 1.442695, %v740_v54 }
 0x510   :  { %v739_v56 = vpop.xlane.xlu1 %738 }
 0x511   :  { %3650 = vpow2.f32 %v742_v55  ;;  %v741_v57 = vsub.f32 %v730_v50, %v739_v56 }
 0x513   :  { %v744_v58 = vmul.f32 1.442695, %v741_v57 }
 0x514   :  { %v985_v1 = vpop.permute.xlu1 %984 }
 0x515   :  { %3652 = vpow2.f32 %v744_v58 }
 0x518   :  { %v905_v6 = vpop.permute.xlu1 %904 }
 0x51c   :  { %v983_v8 = vpop.permute.xlu1 %982 }
 0x51e   :  { %v3651_v59 = vpop.eup %3650 }
 0x51f   :  { %v746_v60 = vsel %vm257_vm2, %v3651_v59, 0.0 }
 0x520   :  { %747 = vadd.xlane.f32.xlu0 %v746_v60 }
 0x522   :  { %v3653_v61 = vpop.eup %3652 }
 0x523   :  { %v749_v62 = vsel %vm257_vm2, %v3653_v61, 0.0 }
 0x524   :  { %750 = vadd.xlane.f32.xlu0 %v749_v62 }
 0x53a   :  { %906 = vrot.lane.b32.xlu0 %v3910_v14, %s3827_s3 }
 0x5a9   :  { %v748_v63 = vpop.xlane.xlu0 %747 }
 0x5aa   :  { %3654 = vrcp.f32 %v748_v63 }
 0x5ad   :  { %v751_v0 = vpop.xlane.xlu0 %750 }
 0x5ae   :  { %3656 = vrcp.f32 %v751_v0 }
 0x5b1   :  { %v907_v4 = vpop.permute.xlu0 %906 }
 0x5b7   :  { %v3655_v2 = vpop.eup %3654 }
 0x5b8   :  { %v754_v3 = vmul.f32 %v3655_v2, %v3651_v59 }
 0x5ba   :  { %3468 = vmatmul.mubr.msk.f32.vlgmr.msra.gmra.mxu0 %vm257_vm2, %v754_v3 }
 0x5bb   :  { %v3657_v5 = vpop.eup %3656  ;;  %3476 = vmatpush3.xpose.msk.msra.mxu0 %vm257_vm2, %v907_v4  ;;  %3477 = vmatprep.mubr.msk.f32.mxu0 %vm3825_vm1, %v3824_v12 }
 0x5bc   :  { %3485 = vmatprep.subr.mxu0 %v3824_v12  ;;  %v755_v7 = vmul.f32 %v3657_v5, %v3653_v61  ;;  %v1590_v5 = vld [vmem:[#allocation8 + $0x10] sm:$0xff] }
 0x5be   :  { %3473 = vmatmul.mubr.msk.f32.vlgmr.msra.gmra.mxu1 %vm257_vm2, %v755_v7  ;;  %3478 = vmatmul.mubr.msk.f32.vlgmr.msra.gmra.mxu0 %vm257_vm2, %v905_v6  ;;  %v1589_v6 = vld [vmem:[#allocation8 + $0x8] sm:$0xff]  ;;  %v1588_v7 = vld [vmem:[#allocation8] sm:$0xff] }
 0x5bf   :  { %3481 = vmatpush3.xpose.msk.msra.mxu1 %vm257_vm2, %v985_v1  ;;  %3486 = vmatpush3.msra.mxu0 %v907_v4  ;;  %v1591_v4 = vld [vmem:[#allocation8 + $0x18] sm:$0xff] }
 0x5c0   :  { %3482 = vmatprep.mubr.msk.f32.mxu1 %vm3825_vm1, %v3824_v12  ;;  %3490 = vmatprep.subr.mxu1 %v3824_v12 }
 0x5c1   :  { %3487 = vmatprep.mubr.msk.f32.mxu0 %vm3825_vm1, %v3824_v12  ;;  %3495 = vmatprep.subr.mxu0 %v3824_v12 }
 0x5c2   :  { %3483 = vmatmul.mubr.msk.f32.vlgmr.msra.gmra.mxu1 %vm257_vm2, %v983_v8  ;;  %v1684_v8 = vld [vmem:[#allocation7 + $0x38] sm:$0xff] }
 0x5c3   :  { %3491 = vmatpush3.msra.mxu1 %v985_v1  ;;  %3492 = vmatprep.mubr.msk.f32.mxu1 %vm3825_vm1, %v3824_v12 }
 0x5c4   :  { %3500 = vmatprep.subr.mxu1 %v3824_v12 }
 0x67a   :  { %v3998_v9 = vpop.f32.mrf.mxu0 }
 0x67c   :  { %v3469_v10 = vpop.f32.mrf.mxu0 }
 0x67e   :  { %v4000_v11 = vpop.f32.mrf.mxu1  ;;  %v978_v17 = vpop.f32.mrf.mxu0 }
 0x67f   :  { %v1060_v18 = vsel %vm257_vm2, %v978_v17, -inf }
 0x680   :  { %1061 = vmax.xlane.f32.xlu0 %v1060_v18  ;;  %v3474_v19 = vpop.f32.mrf.mxu1  ;;  %v3479_v20 = vpop.f32.mrf.mxu0 }
 0x682   :  { %v1056_v21 = vpop.f32.mrf.mxu1 }
 0x683   :  { %v1063_v22 = vsel %vm257_vm2, %v1056_v21, -inf }
 0x684   :  { %1064 = vmax.xlane.f32.xlu1 %v1063_v22  ;;  %v3484_v23 = vpop.f32.mrf.mxu1 }
 0x695   :  { %1310 = vrot.lane.b32.xlu1 %v3906_v13, %s3828_s21 }
 0x699   :  { %1230 = vrot.lane.b32.xlu1 %v3916_v15, %s3828_s21 }
 0x69d   :  { %1308 = vrot.lane.b32.xlu1 %v3929_v16, %s3828_s21 }
 0x709   :  { %v1062_v24 = vpop.xlane.xlu0 %1061 }
 0x70a   :  { %v1066_v25 = vsub.f32 %v978_v17, %v1062_v24 }
 0x70c   :  { %v1068_v26 = vmul.f32 1.442695, %v1066_v25 }
 0x70d   :  { %v1065_v27 = vpop.xlane.xlu1 %1064 }
 0x70e   :  { %3658 = vpow2.f32 %v1068_v26  ;;  %v1067_v28 = vsub.f32 %v1056_v21, %v1065_v27 }
 0x710   :  { %v1070_v29 = vmul.f32 1.442695, %v1067_v28 }
 0x711   :  { %v1311_v33 = vpop.permute.xlu1 %1310 }
 0x712   :  { %3660 = vpow2.f32 %v1070_v29 }
 0x715   :  { %v1231_v38 = vpop.permute.xlu1 %1230 }
 0x719   :  { %v1309_v39 = vpop.permute.xlu1 %1308 }
 0x71b   :  { %v3659_v30 = vpop.eup %3658 }
 0x71c   :  { %v1072_v31 = vsel %vm257_vm2, %v3659_v30, 0.0 }
 0x71d   :  { %1073 = vadd.xlane.f32.xlu0 %v1072_v31  ;;  %v1681_v31 = vld [vmem:[#allocation7 + $0x20] sm:$0xff] }
 0x71f   :  { %v3661_v32 = vpop.eup %3660 }
 0x720   :  { %v1075_v13 = vsel %vm257_vm2, %v3661_v32, 0.0 }
 0x721   :  { %1076 = vadd.xlane.f32.xlu0 %v1075_v13 }
 0x737   :  { %1232 = vrot.lane.b32.xlu0 %v3910_v14, %s3828_s21 }
 0x7a6   :  { %v1074_v15 = vpop.xlane.xlu0 %1073 }
 0x7a7   :  { %3662 = vrcp.f32 %v1074_v15 }
 0x7aa   :  { %v1077_v16 = vpop.xlane.xlu0 %1076 }
 0x7ab   :  { %3664 = vrcp.f32 %v1077_v16 }
 0x7ae   :  { %v1233_v36 = vpop.permute.xlu0 %1232 }
 0x7b4   :  { %v3663_v34 = vpop.eup %3662 }
 0x7b5   :  { %v1080_v35 = vmul.f32 %v3663_v34, %v3659_v30  ;;  %v1682_v30 = vld [vmem:[#allocation7 + $0x28] sm:$0xff] }
 0x7b7   :  { %3488 = vmatmul.mubr.msk.f32.vlgmr.msra.gmra.mxu0 %vm257_vm2, %v1080_v35 }
 0x7b8   :  { %v3665_v37 = vpop.eup %3664  ;;  %3496 = vmatpush3.xpose.msk.msra.mxu0 %vm257_vm2, %v1233_v36  ;;  %3497 = vmatprep.mubr.msk.f32.mxu0 %vm3825_vm1, %v3824_v12 }
 0x7b9   :  { %3505 = vmatprep.subr.mxu0 %v3824_v12  ;;  %v1081_v14 = vmul.f32 %v3665_v37, %v3661_v32  ;;  %v3284_v32 = vld [vmem:[%s4238_s4] ss:$0 sm:$0xff] }
 0x7bb   :  { %3493 = vmatmul.mubr.msk.f32.vlgmr.msra.gmra.mxu1 %vm257_vm2, %v1081_v14  ;;  %3498 = vmatmul.mubr.msk.f32.vlgmr.msra.gmra.mxu0 %vm257_vm2, %v1231_v38 }
 0x7bc   :  { %3501 = vmatpush3.xpose.msk.msra.mxu1 %vm257_vm2, %v1311_v33  ;;  %3506 = vmatpush3.msra.mxu0 %v1233_v36 }
 0x7bd   :  { %3502 = vmatprep.mubr.msk.f32.mxu1 %vm3825_vm1, %v3824_v12  ;;  %3510 = vmatprep.subr.mxu1 %v3824_v12 }
 0x7be   :  { %3507 = vmatprep.mubr.msk.f32.mxu0 %vm3825_vm1, %v3824_v12  ;;  %3515 = vmatprep.subr.mxu0 %v1591_v4 }
 0x7bf   :  { %3503 = vmatmul.mubr.msk.f32.vlgmr.msra.gmra.mxu1 %vm257_vm2, %v1309_v39 }
 0x7c0   :  { %3511 = vmatpush3.msra.mxu1 %v1311_v33  ;;  %3512 = vmatprep.mubr.msk.f32.mxu1 %vm3825_vm1, %v3824_v12 }
 0x7c1   :  { %3526 = vmatprep.subr.mxu1 %v1684_v8 }
 0x877   :  { %v1152_v40 = vpop.f32.mrf.mxu0 }
 0x879   :  { %v3489_v41 = vpop.f32.mrf.mxu0 }
 0x87b   :  { %v1226_v42 = vpop.f32.mrf.mxu1  ;;  %v1304_v44 = vpop.f32.mrf.mxu0 }
 0x87c   :  { %v1386_v46 = vsel %vm257_vm2, %v1304_v44, -inf }
 0x87d   :  { %1387 = vmax.xlane.f32.xlu0 %v1386_v46  ;;  %v3494_v47 = vpop.f32.mrf.mxu1  ;;  %v3499_v48 = vpop.f32.mrf.mxu0 }
 0x87f   :  { %v1382_v49 = vpop.f32.mrf.mxu1 }
 0x880   :  { %v1389_v50 = vsel %vm257_vm2, %v1382_v49, -inf }
 0x881   :  { %1390 = vmax.xlane.f32.xlu1 %v1389_v50  ;;  %v3504_v51 = vpop.f32.mrf.mxu1 }
 0x892   :  { %1560 = vrot.lane.b32.xlu1 %v4000_v11, %s3821_s30 }
 0x896   :  { %1566 = vrot.lane.b32.xlu1 %v1152_v40, %s3829_s22 }
 0x89a   :  { %1568 = vrot.lane.b32.xlu1 %v1226_v42, %s3829_s22 }
 0x906   :  { %v1388_v52 = vpop.xlane.xlu0 %1387 }
 0x907   :  { %v1392_v53 = vsub.f32 %v1304_v44, %v1388_v52 }
 0x909   :  { %v1394_v54 = vmul.f32 1.442695, %v1392_v53 }
 0x90a   :  { %v1391_v55 = vpop.xlane.xlu1 %1390 }
 0x90b   :  { %3666 = vpow2.f32 %v1394_v54  ;;  %v1393_v56 = vsub.f32 %v1382_v49, %v1391_v55 }
 0x90d   :  { %v1396_v57 = vmul.f32 1.442695, %v1393_v56 }
 0x90e   :  { %v1561_v18 = vpop.permute.xlu1 %1560 }
 0x90f   :  { %3668 = vpow2.f32 %v1396_v57  ;;  %v1581_v26 = vsel %vm257_vm2, %v3966_v45, %v1561_v18 }
 0x912   :  { %v1567_v19 = vpop.permute.xlu1 %1566 }
 0x916   :  { %v1569_v22 = vpop.permute.xlu1 %1568 }
 0x917   :  { %v1584_v27 = vsel %vm1582_vm4, %v1581_v26, %v1569_v22 }
 0x918   :  { %v3667_v58 = vpop.eup %3666 }
 0x919   :  { %v1398_v59 = vsel %vm257_vm2, %v3667_v58, 0.0 }
 0x91a   :  { %1399 = vadd.xlane.f32.xlu0 %v1398_v59 }
 0x91c   :  { %v3669_v60 = vpop.eup %3668 }
 0x91d   :  { %v1401_v61 = vsel %vm257_vm2, %v3669_v60, 0.0 }
 0x91e   :  { %1402 = vadd.xlane.f32.xlu0 %v1401_v61 }
 0x934   :  { %1558 = vrot.lane.b32.xlu0 %v3998_v9, %s3821_s30 }
 0x9a3   :  { %v1400_v62 = vpop.xlane.xlu0 %1399 }
 0x9a4   :  { %3670 = vrcp.f32 %v1400_v62 }
 0x9a7   :  { %v1403_v63 = vpop.xlane.xlu0 %1402 }
 0x9a8   :  { %3672 = vrcp.f32 %v1403_v63 }
 0x9ab   :  { %v1559_v20 = vpop.permute.xlu0 %1558 }
 0x9ac   :  { %v1580_v21 = vsel %vm257_vm2, %v3964_v43, %v1559_v20  ;;  %v1683_v43 = vld [vmem:[#allocation7 + $0x30] sm:$0xff] }
 0x9ad   :  { %v1583_v24 = vsel %vm1582_vm4, %v1580_v21, %v1567_v19 }
 0x9b1   :  { %v3671_v0 = vpop.eup %3670 }
 0x9b2   :  { %v1406_v1 = vmul.f32 %v3671_v0, %v3667_v58 }
 0x9b4   :  { %3508 = vmatmul.mubr.msk.f32.vlgmr.msra.gmra.mxu0 %vm257_vm2, %v1406_v1 }
 0x9b5   :  { %v3673_v2 = vpop.eup %3672  ;;  %3516 = vmatpush3.msra.mxu0 %v1591_v4 }
 0x9b6   :  { %v1407_v3 = vmul.f32 %v3673_v2, %v3669_v60  ;;  %3517 = vmatprep.subr.mxu0 %v1590_v5 }
 0x9b7   :  { %3518 = vmatpush3.msra.mxu0 %v1590_v5 }
 0x9b8   :  { %3513 = vmatmul.mubr.msk.f32.vlgmr.msra.gmra.mxu1 %vm257_vm2, %v1407_v3  ;;  %3519 = vmatprep.subr.mxu0 %v1589_v6 }
 0x9b9   :  { %3520 = vmatpush3.msra.mxu0 %v1589_v6  ;;  %3527 = vmatpush3.msra.mxu1 %v1684_v8 }
 0x9ba   :  { %3521 = vmatprep.subr.mxu0 %v1588_v7  ;;  %3528 = vmatprep.subr.mxu1 %v1683_v43 }
 0x9bb   :  { %3522 = vmatpush3.msra.mxu0 %v1588_v7  ;;  %3529 = vmatpush3.msra.mxu1 %v1683_v43 }
 0x9bc   :  { %3537 = vmatprep.subr.mxu0 %v3824_v12  ;;  %3530 = vmatprep.subr.mxu1 %v1682_v30 }
 0x9bd   :  { %3531 = vmatpush3.msra.mxu1 %v1682_v30 }
 0x9be   :  { %3532 = vmatprep.subr.mxu1 %v1681_v31 }
 0x9bf   :  { %3533 = vmatpush3.msra.mxu1 %v1681_v31 }
 0x9c0   :  { %3542 = vmatprep.subr.mxu1 %v3824_v12 }
 0xa74   :  { %v1478_v9 = vpop.f32.mrf.mxu0 }
 0xa75   :  { %1574 = vrot.lane.b32.xlu0 %v1478_v9, %s3830_s23 }
 0xa76   :  { %v3509_v10 = vpop.f32.mrf.mxu0 }
 0xa78   :  { %v1552_v11 = vpop.f32.mrf.mxu1 }
 0xa79   :  { %1576 = vrot.lane.b32.xlu1 %v1552_v11, %s3830_s23 }
 0xa7a   :  { %v3514_v17 = vpop.f32.mrf.mxu1 }
 0xae7   :  { %v1575_v23 = vpop.permute.xlu0 %1574 }
 0xae8   :  { %v1586_v25 = vsel %vm1585_vm3, %v1583_v24, %v1575_v23 }
 0xae9   :  { %3523 = vmatprep.mubr.msk.f32.mxu0 %vm88_vm0, %v1586_v25 }
 0xaeb   :  { %v1577_v28 = vpop.permute.xlu1 %1576 }
 0xaec   :  { %v1587_v29 = vsel %vm1585_vm3, %v1584_v27, %v1577_v28 }
 0xaed   :  { %3524 = vmatmul.mubr.msk.f32.vlgmr.msra.gmra.mxu0 %vm88_vm0, %v1587_v29 }
 0xaee   :  { %3539 = vmatprep.mubr.msk.f32.mxu0 %vm3825_vm1, %v3824_v12 }
 0xbad   :  { %v3525_v45 = vpop.f32.mrf.mxu0 }
 0xbae   :  { %v1677_v16 = vadd.f32 %v3525_v45, %v3284_v32 }
 0xbaf   :  { %v1671_v13 = vpop.f32.mrf.mxu0 }
 0xbb0   :  { %v1672_v15 = vadd.f32 %v3284_v32, %v1671_v13 }
 0xbb2   :  { %3534 = vmatprep.mubr.msk.f32.mxu1 %vm88_vm0, %v1672_v15 }
 0xbb3   :  { %3535 = vmatmul.mubr.msk.f32.vlgmr.msra.gmra.mxu1 %vm88_vm0, %v1677_v16 }
 0xbb4   :  { %3544 = vmatprep.mubr.msk.f32.mxu1 %vm3825_vm1, %v3824_v12 }
 0xc73   :  { %v4065_v33 = vpop.f32.mrf.mxu1 }
 0xc74   :  { %v4068_v34 = vmul.f32 0.35355338, %v4065_v33  ;;  %3543 = vmatpush3.xpose.msk.msra.mxu1 %vm257_vm2, %v4065_v33 }
 0xc75   :  { %v4072_v35 = vpop.f32.mrf.mxu1  ;;  %3552 = vmatprep.subr.mxu1 %v3824_v12 }
 0xc76   :  { %v4076_v36 = vmul.f32 0.35355338, %v4072_v35  ;;  %3538 = vmatpush3.xpose.msk.msra.mxu0 %vm257_vm2, %v4072_v35 }
 0xc77   :  { %3545 = vmatmul.mubr.msk.f32.vlgmr.msra.gmra.mxu1 %vm257_vm2, %v4068_v34  ;;  %3547 = vmatprep.subr.mxu0 %v3824_v12 }
 0xc78   :  { %3553 = vmatpush3.msra.mxu1 %v4065_v33  ;;  %3554 = vmatprep.mubr.msk.f32.mxu1 %vm3825_vm1, %v3824_v12 }
 0xc79   :  { %3540 = vmatmul.mubr.msk.f32.vlgmr.msra.gmra.mxu0 %vm257_vm2, %v4076_v36  ;;  %3562 = vmatprep.subr.mxu1 %v3824_v12 }
 0xc7a   :  { %3548 = vmatpush3.msra.mxu0 %v4072_v35  ;;  %3549 = vmatprep.mubr.msk.f32.mxu0 %vm3825_vm1, %v3824_v12 }
 0xc7b   :  { %3557 = vmatprep.subr.mxu0 %v3824_v12 }
 0xd37   :  { %v1916_v37 = vpop.f32.mrf.mxu1 }
 0xd38   :  { %v1923_v38 = vsel %vm257_vm2, %v1916_v37, -inf }
 0xd39   :  { %1924 = vmax.xlane.f32.xlu1 %v1923_v38  ;;  %v1840_v14 = vpop.f32.mrf.mxu0  ;;  %v3546_v39 = vpop.f32.mrf.mxu1 }
 0xd3a   :  { %v1920_v40 = vsel %vm257_vm2, %v1840_v14, -inf }
 0xd3b   :  { %1921 = vmax.xlane.f32.xlu0 %v1920_v40  ;;  %v3541_v41 = vpop.f32.mrf.mxu0 }
 0xd4a   :  { %2168 = vrot.lane.b32.xlu1 %v4065_v33, %s3826_s2 }
 0xd4e   :  { %2088 = vrot.lane.b32.xlu1 %v4076_v36, %s3826_s2 }
 0xd52   :  { %2166 = vrot.lane.b32.xlu1 %v4068_v34, %s3826_s2 }
 0xdc2   :  { %v1925_v42 = vpop.xlane.xlu1 %1924 }
 0xdc3   :  { %v1927_v44 = vsub.f32 %v1916_v37, %v1925_v42 }
 0xdc4   :  { %v1922_v46 = vpop.xlane.xlu0 %1921 }
 0xdc5   :  { %v1930_v47 = vmul.f32 1.442695, %v1927_v44  ;;  %v1926_v48 = vsub.f32 %v1840_v14, %v1922_v46 }
 0xdc6   :  { %v2169_v56 = vpop.permute.xlu1 %2168 }
 0xdc7   :  { %3674 = vpow2.f32 %v1930_v47  ;;  %v1928_v49 = vmul.f32 1.442695, %v1926_v48 }
 0xdc9   :  { %3676 = vpow2.f32 %v1928_v49 }
 0xdca   :  { %v2089_v58 = vpop.permute.xlu1 %2088 }
 0xdce   :  { %v2167_v62 = vpop.permute.xlu1 %2166 }
 0xdd4   :  { %v3675_v50 = vpop.eup %3674 }
 0xdd5   :  { %v1935_v51 = vsel %vm257_vm2, %v3675_v50, 0.0 }
 0xdd6   :  { %v3677_v52 = vpop.eup %3676  ;;  %1936 = vadd.xlane.f32.xlu0 %v1935_v51 }
 0xdd7   :  { %v1932_v53 = vsel %vm257_vm2, %v3677_v52, 0.0 }
 0xdda   :  { %1933 = vadd.xlane.f32.xlu0 %v1932_v53 }
 0xdf0   :  { %2090 = vrot.lane.b32.xlu0 %v4072_v35, %s3826_s2 }
 0xe5f   :  { %v1937_v54 = vpop.xlane.xlu0 %1936 }
 0xe60   :  { %3678 = vrcp.f32 %v1937_v54 }
 0xe63   :  { %v1934_v55 = vpop.xlane.xlu0 %1933 }
 0xe64   :  { %3680 = vrcp.f32 %v1934_v55 }
 0xe67   :  { %v2091_v63 = vpop.permute.xlu0 %2090 }
 0xe6d   :  { %v3679_v57 = vpop.eup %3678 }
 0xe6e   :  { %v1941_v59 = vmul.f32 %v3679_v57, %v3675_v50 }
 0xe70   :  { %3555 = vmatmul.mubr.msk.f32.vlgmr.msra.gmra.mxu1 %vm257_vm2, %v1941_v59 }
 0xe71   :  { %v3681_v60 = vpop.eup %3680  ;;  %3563 = vmatpush3.xpose.msk.msra.mxu1 %vm257_vm2, %v2169_v56  ;;  %3564 = vmatprep.mubr.msk.f32.mxu1 %vm3825_vm1, %v3824_v12 }
 0xe72   :  { %3572 = vmatprep.subr.mxu1 %v3824_v12  ;;  %v1940_v61 = vmul.f32 %v3681_v60, %v3677_v52 }
 0xe74   :  { %3550 = vmatmul.mubr.msk.f32.vlgmr.msra.gmra.mxu0 %vm257_vm2, %v1940_v61  ;;  %3565 = vmatmul.mubr.msk.f32.vlgmr.msra.gmra.mxu1 %vm257_vm2, %v2167_v62 }
 0xe75   :  { %3558 = vmatpush3.xpose.msk.msra.mxu0 %vm257_vm2, %v2091_v63  ;;  %3573 = vmatpush3.msra.mxu1 %v2169_v56 }
 0xe76   :  { %3559 = vmatprep.mubr.msk.f32.mxu0 %vm3825_vm1, %v3824_v12  ;;  %3567 = vmatprep.subr.mxu0 %v3824_v12 }
 0xe77   :  { %3574 = vmatprep.mubr.msk.f32.mxu1 %vm3825_vm1, %v3824_v12  ;;  %3582 = vmatprep.subr.mxu1 %v3824_v12 }
 0xe78   :  { %3560 = vmatmul.mubr.msk.f32.vlgmr.msra.gmra.mxu0 %vm257_vm2, %v2089_v58 }
 0xe79   :  { %3568 = vmatpush3.msra.mxu0 %v2091_v63  ;;  %3569 = vmatprep.mubr.msk.f32.mxu0 %vm3825_vm1, %v3824_v12 }
 0xe7a   :  { %3577 = vmatprep.subr.mxu0 %v3824_v12 }
 0xf30   :  { %v4123_v0 = vpop.f32.mrf.mxu1 }
 0xf32   :  { %v3556_v1 = vpop.f32.mrf.mxu1 }
 0xf34   :  { %v4125_v2 = vpop.f32.mrf.mxu0  ;;  %v2240_v3 = vpop.f32.mrf.mxu1 }
 0xf35   :  { %v2247_v4 = vsel %vm257_vm2, %v2240_v3, -inf }
 0xf36   :  { %2248 = vmax.xlane.f32.xlu1 %v2247_v4  ;;  %v3551_v5 = vpop.f32.mrf.mxu0  ;;  %v3566_v6 = vpop.f32.mrf.mxu1 }
 0xf38   :  { %v2162_v7 = vpop.f32.mrf.mxu0 }
 0xf39   :  { %v2244_v8 = vsel %vm257_vm2, %v2162_v7, -inf }
 0xf3a   :  { %2245 = vmax.xlane.f32.xlu0 %v2244_v8  ;;  %v3561_v9 = vpop.f32.mrf.mxu0 }
 0xf47   :  { %2494 = vrot.lane.b32.xlu1 %v4065_v33, %s3827_s3 }
 0xf4b   :  { %2414 = vrot.lane.b32.xlu1 %v4076_v36, %s3827_s3 }
 0xf4f   :  { %2492 = vrot.lane.b32.xlu1 %v4068_v34, %s3827_s3 }
 0xfbf   :  { %v2249_v10 = vpop.xlane.xlu1 %2248 }
 0xfc0   :  { %v2251_v11 = vsub.f32 %v2240_v3, %v2249_v10 }
 0xfc2   :  { %v2254_v17 = vmul.f32 1.442695, %v2251_v11 }
 0xfc3   :  { %v2246_v18 = vpop.xlane.xlu0 %2245  ;;  %v2495_v27 = vpop.permute.xlu1 %2494 }
 0xfc4   :  { %3682 = vpow2.f32 %v2254_v17  ;;  %v2250_v19 = vsub.f32 %v2162_v7, %v2246_v18 }
 0xfc6   :  { %v2252_v20 = vmul.f32 1.442695, %v2250_v19 }
 0xfc7   :  { %v2415_v29 = vpop.permute.xlu1 %2414 }
 0xfc8   :  { %3684 = vpow2.f32 %v2252_v20 }
 0xfcb   :  { %v2493_v45 = vpop.permute.xlu1 %2492 }
 0xfd1   :  { %v3683_v21 = vpop.eup %3682 }
 0xfd2   :  { %v2259_v22 = vsel %vm257_vm2, %v3683_v21, 0.0 }
 0xfd3   :  { %2260 = vadd.xlane.f32.xlu0 %v2259_v22 }
 0xfd5   :  { %v3685_v23 = vpop.eup %3684 }
 0xfd6   :  { %v2256_v24 = vsel %vm257_vm2, %v3685_v23, 0.0 }
 0xfd7   :  { %2257 = vadd.xlane.f32.xlu0 %v2256_v24 }
 0xfed   :  { %2416 = vrot.lane.b32.xlu0 %v4072_v35, %s3827_s3 }
0x105c   :  { %v2261_v25 = vpop.xlane.xlu0 %2260 }
0x105d   :  { %3686 = vrcp.f32 %v2261_v25 }
0x1060   :  { %v2258_v26 = vpop.xlane.xlu0 %2257 }
0x1061   :  { %3688 = vrcp.f32 %v2258_v26 }
0x1064   :  { %v2417_v32 = vpop.permute.xlu0 %2416 }
0x106a   :  { %v3687_v28 = vpop.eup %3686 }
0x106b   :  { %v2265_v43 = vmul.f32 %v3687_v28, %v3683_v21 }
0x106d   :  { %3575 = vmatmul.mubr.msk.f32.vlgmr.msra.gmra.mxu1 %vm257_vm2, %v2265_v43  ;;  %v3099_v43 = vld [vmem:[#allocation8 + $0x30] sm:$0xff] }
0x106e   :  { %v3689_v30 = vpop.eup %3688  ;;  %3583 = vmatpush3.xpose.msk.msra.mxu1 %vm257_vm2, %v2495_v27  ;;  %3584 = vmatprep.mubr.msk.f32.mxu1 %vm3825_vm1, %v3824_v12 }
0x106f   :  { %3592 = vmatprep.subr.mxu1 %v3824_v12  ;;  %v2264_v31 = vmul.f32 %v3689_v30, %v3685_v23  ;;  %v3098_v30 = vld [vmem:[#allocation8 + $0x28] sm:$0xff] }
0x1071   :  { %3570 = vmatmul.mubr.msk.f32.vlgmr.msra.gmra.mxu0 %vm257_vm2, %v2264_v31  ;;  %3585 = vmatmul.mubr.msk.f32.vlgmr.msra.gmra.mxu1 %vm257_vm2, %v2493_v45  ;;  %v3097_v31 = vld [vmem:[#allocation8 + $0x20] sm:$0xff] }
0x1072   :  { %3578 = vmatpush3.xpose.msk.msra.mxu0 %vm257_vm2, %v2417_v32  ;;  %3593 = vmatpush3.msra.mxu1 %v2495_v27 }
0x1073   :  { %3579 = vmatprep.mubr.msk.f32.mxu0 %vm3825_vm1, %v3824_v12  ;;  %3587 = vmatprep.subr.mxu0 %v3824_v12 }
0x1074   :  { %3594 = vmatprep.mubr.msk.f32.mxu1 %vm3825_vm1, %v3824_v12  ;;  %3602 = vmatprep.subr.mxu1 %v3824_v12 }
0x1075   :  { %3580 = vmatmul.mubr.msk.f32.vlgmr.msra.gmra.mxu0 %vm257_vm2, %v2415_v29  ;;  %v3100_v29 = vld [vmem:[#allocation8 + $0x38] sm:$0xff] }
0x1076   :  { %3588 = vmatpush3.msra.mxu0 %v2417_v32  ;;  %3589 = vmatprep.mubr.msk.f32.mxu0 %vm3825_vm1, %v3824_v12 }
0x1077   :  { %3597 = vmatprep.subr.mxu0 %v3824_v12 }
0x112d   :  { %v4157_v13 = vpop.f32.mrf.mxu1 }
0x112f   :  { %v3576_v15 = vpop.f32.mrf.mxu1 }
0x1131   :  { %v4159_v16 = vpop.f32.mrf.mxu0  ;;  %v2566_v37 = vpop.f32.mrf.mxu1 }
0x1132   :  { %v2573_v38 = vsel %vm257_vm2, %v2566_v37, -inf }
0x1133   :  { %2574 = vmax.xlane.f32.xlu1 %v2573_v38  ;;  %v3571_v14 = vpop.f32.mrf.mxu0  ;;  %v3586_v39 = vpop.f32.mrf.mxu1 }
0x1135   :  { %v2488_v40 = vpop.f32.mrf.mxu0 }
0x1136   :  { %v2570_v41 = vsel %vm257_vm2, %v2488_v40, -inf }
0x1137   :  { %2571 = vmax.xlane.f32.xlu0 %v2570_v41  ;;  %v3581_v42 = vpop.f32.mrf.mxu0 }
0x1144   :  { %2820 = vrot.lane.b32.xlu1 %v4065_v33, %s3828_s21 }
0x1148   :  { %2740 = vrot.lane.b32.xlu1 %v4076_v36, %s3828_s21 }
0x114c   :  { %2818 = vrot.lane.b32.xlu1 %v4068_v34, %s3828_s21 }
0x11bc   :  { %v2575_v44 = vpop.xlane.xlu1 %2574 }
0x11bd   :  { %v2577_v46 = vsub.f32 %v2566_v37, %v2575_v44 }
0x11bf   :  { %v2580_v47 = vmul.f32 1.442695, %v2577_v46 }
0x11c0   :  { %v2572_v48 = vpop.xlane.xlu0 %2571  ;;  %v2821_v54 = vpop.permute.xlu1 %2820 }
0x11c1   :  { %3690 = vpow2.f32 %v2580_v47  ;;  %v2576_v49 = vsub.f32 %v2488_v40, %v2572_v48 }
0x11c3   :  { %v2578_v50 = vmul.f32 1.442695, %v2576_v49 }
0x11c4   :  { %v2741_v56 = vpop.permute.xlu1 %2740 }
0x11c5   :  { %3692 = vpow2.f32 %v2578_v50 }
0x11ce   :  { %v3691_v51 = vpop.eup %3690 }
0x11cf   :  { %v2585_v52 = vsel %vm257_vm2, %v3691_v51, 0.0 }
0x11d0   :  { %2586 = vadd.xlane.f32.xlu0 %v2585_v52 }
0x11d2   :  { %v3693_v53 = vpop.eup %3692 }
0x11d3   :  { %v2582_v33 = vsel %vm257_vm2, %v3693_v53, 0.0 }
0x11d4   :  { %2583 = vadd.xlane.f32.xlu0 %v2582_v33 }
0x11ea   :  { %2742 = vrot.lane.b32.xlu0 %v4072_v35, %s3828_s21  ;;  %v2819_v35 = vpop.permute.xlu1 %2818 }
0x1259   :  { %v2587_v34 = vpop.xlane.xlu0 %2586 }
0x125a   :  { %3694 = vrcp.f32 %v2587_v34 }
0x125d   :  { %v2584_v36 = vpop.xlane.xlu0 %2583 }
0x125e   :  { %3696 = vrcp.f32 %v2584_v36 }
0x1261   :  { %v2743_v60 = vpop.permute.xlu0 %2742 }
0x1267   :  { %v3695_v55 = vpop.eup %3694 }
0x1268   :  { %v2591_v57 = vmul.f32 %v3695_v55, %v3691_v51 }
0x126a   :  { %3595 = vmatmul.mubr.msk.f32.vlgmr.msra.gmra.mxu1 %vm257_vm2, %v2591_v57 }
0x126b   :  { %v3697_v58 = vpop.eup %3696  ;;  %3603 = vmatpush3.xpose.msk.msra.mxu1 %vm257_vm2, %v2821_v54  ;;  %3604 = vmatprep.mubr.msk.f32.mxu1 %vm3825_vm1, %v3824_v12 }
0x126c   :  { %3612 = vmatprep.subr.mxu1 %v3824_v12  ;;  %v2590_v59 = vmul.f32 %v3697_v58, %v3693_v53 }
0x126e   :  { %3590 = vmatmul.mubr.msk.f32.vlgmr.msra.gmra.mxu0 %vm257_vm2, %v2590_v59  ;;  %3605 = vmatmul.mubr.msk.f32.vlgmr.msra.gmra.mxu1 %vm257_vm2, %v2819_v35 }
0x126f   :  { %3598 = vmatpush3.xpose.msk.msra.mxu0 %vm257_vm2, %v2743_v60  ;;  %3613 = vmatpush3.msra.mxu1 %v2821_v54 }
0x1270   :  { %3599 = vmatprep.mubr.msk.f32.mxu0 %vm3825_vm1, %v3824_v12  ;;  %3607 = vmatprep.subr.mxu0 %v3824_v12 }
0x1271   :  { %3614 = vmatprep.mubr.msk.f32.mxu1 %vm3825_vm1, %v3824_v12 }
0x1272   :  { %3600 = vmatmul.mubr.msk.f32.vlgmr.msra.gmra.mxu0 %vm257_vm2, %v2741_v56 }
0x1273   :  { %3608 = vmatpush3.msra.mxu0 %v2743_v60  ;;  %3609 = vmatprep.mubr.msk.f32.mxu0 %vm3825_vm1, %v3824_v12 }
0x1274   :  { %3617 = vmatprep.subr.mxu0 %v3100_v29 }
0x132a   :  { %v2736_v61 = vpop.f32.mrf.mxu1 }
0x132c   :  { %v3596_v62 = vpop.f32.mrf.mxu1 }
0x132e   :  { %v2662_v63 = vpop.f32.mrf.mxu0  ;;  %v2892_v1 = vpop.f32.mrf.mxu1 }
0x132f   :  { %v2899_v3 = vsel %vm257_vm2, %v2892_v1, -inf }
0x1330   :  { %2900 = vmax.xlane.f32.xlu1 %v2899_v3  ;;  %v3591_v4 = vpop.f32.mrf.mxu0  ;;  %v3606_v5 = vpop.f32.mrf.mxu1 }
0x1331   :  { %v3317_v5 = vld [vmem:[%s4239_s5] ss:$0 sm:$0xff] }
0x1332   :  { %v2814_v6 = vpop.f32.mrf.mxu0 }
0x1333   :  { %v2896_v7 = vsel %vm257_vm2, %v2814_v6, -inf }
0x1334   :  { %2897 = vmax.xlane.f32.xlu0 %v2896_v7  ;;  %v3601_v8 = vpop.f32.mrf.mxu0  ;;  %v3318_v7 = vld [vmem:[%s4240_s6] ss:$0 sm:$0xff] }
0x1341   :  { %3070 = vrot.lane.b32.xlu1 %v4157_v13, %s3821_s30 }
0x1345   :  { %3076 = vrot.lane.b32.xlu1 %v2662_v63, %s3829_s22 }
0x1349   :  { %3078 = vrot.lane.b32.xlu1 %v2736_v61, %s3829_s22 }
0x13b9   :  { %v2901_v12 = vpop.xlane.xlu1 %2900 }
0x13ba   :  { %v2903_v9 = vsub.f32 %v2892_v1, %v2901_v12 }
0x13bc   :  { %v2906_v17 = vmul.f32 1.442695, %v2903_v9 }
0x13bd   :  { %v2898_v10 = vpop.xlane.xlu0 %2897 }
0x13be   :  { %v2902_v11 = vsub.f32 %v2814_v6, %v2898_v10 }
0x13c0   :  { %v2904_v18 = vmul.f32 1.442695, %v2902_v11 }
0x13c2   :  { %3698 = vpow2.f32 %v2904_v18 }
0x13c3   :  { %3700 = vpow2.f32 %v2906_v17 }
0x13cf   :  { %v3699_v19 = vpop.eup %3698 }
0x13d0   :  { %v2908_v20 = vsel %vm257_vm2, %v3699_v19, 0.0  ;;  %v3701_v21 = vpop.eup %3700 }
0x13d1   :  { %2909 = vadd.xlane.f32.xlu0 %v2908_v20  ;;  %v2911_v22 = vsel %vm257_vm2, %v3701_v21, 0.0 }
0x13d5   :  { %2912 = vadd.xlane.f32.xlu0 %v2911_v22 }
0x13eb   :  { %3068 = vrot.lane.b32.xlu0 %v4159_v16, %s3821_s30  ;;  %v3071_v16 = vpop.permute.xlu1 %3070 }
0x13ec   :  { %v3091_v44 = vsel %vm257_vm2, %v4123_v0, %v3071_v16 }
0x13ef   :  { %v3077_v37 = vpop.permute.xlu1 %3076 }
0x13f3   :  { %v3079_v39 = vpop.permute.xlu1 %3078 }
0x13f4   :  { %v3093_v46 = vsel %vm1582_vm4, %v3091_v44, %v3079_v39 }
0x145a   :  { %v2910_v23 = vpop.xlane.xlu0 %2909 }
0x145b   :  { %3702 = vrcp.f32 %v2910_v23 }
0x145e   :  { %v2913_v24 = vpop.xlane.xlu0 %2912 }
0x145f   :  { %3704 = vrcp.f32 %v2913_v24 }
0x1462   :  { %v3069_v38 = vpop.permute.xlu0 %3068 }
0x1463   :  { %v3090_v14 = vsel %vm257_vm2, %v4125_v2, %v3069_v38  ;;  %v3314_v2 = vld [vmem:[%s4238_s4 + $0x1] ss:$0 sm:$0xff] }
0x1464   :  { %v3092_v40 = vsel %vm1582_vm4, %v3090_v14, %v3077_v37 }
0x1468   :  { %v3703_v25 = vpop.eup %3702 }
0x1469   :  { %v2916_v26 = vmul.f32 %v3703_v25, %v3699_v19 }
0x146b   :  { %3610 = vmatmul.mubr.msk.f32.vlgmr.msra.gmra.mxu0 %vm257_vm2, %v2916_v26 }
0x146c   :  { %v3705_v27 = vpop.eup %3704  ;;  %3618 = vmatpush3.msra.mxu0 %v3100_v29 }
0x146d   :  { %v2917_v28 = vmul.f32 %v3705_v27, %v3701_v21  ;;  %3619 = vmatprep.subr.mxu0 %v3099_v43 }
0x146e   :  { %3620 = vmatpush3.msra.mxu0 %v3099_v43 }
0x146f   :  { %3615 = vmatmul.mubr.msk.f32.vlgmr.msra.gmra.mxu1 %vm257_vm2, %v2917_v28  ;;  %3621 = vmatprep.subr.mxu0 %v3098_v30 }
0x1470   :  { %3622 = vmatpush3.msra.mxu0 %v3098_v30 }
0x1471   :  { %3623 = vmatprep.subr.mxu0 %v3097_v31 }
0x1472   :  { %3624 = vmatpush3.msra.mxu0 %v3097_v31 }
0x152b   :  { %v2988_v45 = vpop.f32.mrf.mxu0 }
0x152c   :  { %3084 = vrot.lane.b32.xlu0 %v2988_v45, %s3830_s23 }
0x152d   :  { %v3611_v32 = vpop.f32.mrf.mxu0 }
0x152f   :  { %v3062_v13 = vpop.f32.mrf.mxu1 }
0x1530   :  { %3086 = vrot.lane.b32.xlu1 %v3062_v13, %s3830_s23 }
0x1531   :  { %v3616_v15 = vpop.f32.mrf.mxu1 }
0x159e   :  { %v3085_v41 = vpop.permute.xlu0 %3084 }
0x159f   :  { %v3094_v42 = vsel %vm1585_vm3, %v3092_v40, %v3085_v41 }
0x15a0   :  { %3625 = vmatprep.mubr.msk.f32.mxu0 %vm88_vm0, %v3094_v42 }
0x15a2   :  { %v3087_v47 = vpop.permute.xlu1 %3086 }
0x15a3   :  { %v3095_v48 = vsel %vm1585_vm3, %v3093_v46, %v3087_v47 }
0x15a4   :  { %3626 = vmatmul.mubr.msk.f32.vlgmr.msra.gmra.mxu0 %vm88_vm0, %v3095_v48 }
0x1664   :  { %v3627_v49 = vpop.f32.mrf.mxu0 }
0x1665   :  { %v3187_v50 = vadd.f32 %v3627_v49, %v3314_v2 }
0x1666   :  { %v3181_v51 = vpop.f32.mrf.mxu0 }
0x1667   :  { %v3182_v52 = vadd.f32 %v3314_v2, %v3181_v51  ;;  %v3193_v53 = vsel %vm88_vm0, %v3187_v50, 0.0 }
0x1668   :  { %3194 = vadd.xlane.f32.xlu1 %v3193_v53 }
0x1669   :  { %v3190_v0 = vsel %vm88_vm0, %v3182_v52, 0.0 }
0x166a   :  { %3191 = vadd.xlane.f32.xlu0 %v3190_v0 }
0x16f1   :  { %v3195_v33 = vpop.xlane.xlu1 %3194 }
0x16f2   :  { %v3198_v34 = vmul.f32 0.03125, %v3195_v33 }
0x16f3   :  { %v3192_v36 = vpop.xlane.xlu0 %3191 }
0x16f4   :  { %v3197_v54 = vmul.f32 0.03125, %v3192_v36  ;;  %v3200_v55 = vsub.f32 %v3187_v50, %v3198_v34 }
0x16f6   :  { %v3199_v56 = vsub.f32 %v3182_v52, %v3197_v54  ;;  %v3202_v59 = vmul.f32 %v3200_v55, %v3200_v55 }
0x16f8   :  { %v3201_v57 = vmul.f32 %v3199_v56, %v3199_v56  ;;  %v3206_v35 = vsel %vm88_vm0, %v3202_v59, 0.0 }
0x16fa   :  { %v3203_v58 = vsel %vm88_vm0, %v3201_v57, 0.0 }
0x16fb   :  { %3204 = vadd.xlane.f32.xlu0 %v3203_v58 }
0x16ff   :  { %3207 = vadd.xlane.f32.xlu0 %v3206_v35 }
0x1784   :  { %v3205_v60 = vpop.xlane.xlu0 %3204 }
0x1785   :  { %v3209_v61 = vmul.f32 0.03125, %v3205_v60 }
0x1787   :  { %v3211_v62 = vadd.f32 1e-05, %v3209_v61 }
0x1788   :  { %v3208_v63 = vpop.xlane.xlu0 %3207 }
0x1789   :  { %3706 = vrsqrt.f32 %v3211_v62  ;;  %v3210_v1 = vmul.f32 0.03125, %v3208_v63 }
0x178b   :  { %v3212_v3 = vadd.f32 1e-05, %v3210_v1 }
0x178d   :  { %3708 = vrsqrt.f32 %v3212_v3 }
0x1796   :  { %v3707_v4 = vpop.eup %3706 }
0x1797   :  { %v3215_v6 = vmul.f32 %v3707_v4, %v3199_v56 }
0x1799   :  { %v3224_v8 = vmul.f32 %v3317_v5, %v3215_v6 }
0x179a   :  { %v3709_v12 = vpop.eup %3708 }
0x179b   :  { %v3216_v9 = vmul.f32 %v3709_v12, %v3200_v55  ;;  %v3233_v10 = vadd.f32 %v3318_v7, %v3224_v8 }
0x179d   :  { %v3225_v11 = vmul.f32 %v3317_v5, %v3216_v9  ;;  %3235 = vst.msk [vmem:[#allocation10] sm:$0xff] %vm88_vm0, %v3233_v10 }
0x179f   :  { %v3234_v17 = vadd.f32 %v3318_v7, %v3225_v11 }
0x17a1   :  { %3236 = vst.msk [vmem:[#allocation10 + $0x8] sm:$0xff] %vm88_vm0, %v3234_v17 }
0x17a2   :  { %3801 = shalt.err (!%p3798_p10)
}
0x17a3   :  { %3248 = dma.vmem_to_hbm [thread:$0]  %s3243_s11, 256, %s4241_s7, [#allocation4], %s3820_s29, %s3820_s29, %s3821_s30  }
0x17a4   :  { %3816 = dma.done.wait [#allocation4], 256  }
0x17a5   :  { %3817 = vsyncadd [#allocation4], 4294967040 }
0x17a6   :  { %3252 = vsyncpa [#allocation3], 1 }
0x17a7   :  { %3253 = vsyncpa [#allocation6], 1 }
0x17a8   :  { %3254 = vsyncpa [#allocation9], 1 }
0x17a9   :  { %3255 = vsyncpa [#allocation4], 1 }

</bundles_post_ra>
